<compile_context>
chip_gen: v5e
topology: v5e:2x2
jax: 0.10.0
libtpu: 0.0.40
codegen_flags: <defaults>
</compile_context>

<pallas_src>
import functools

import jax
import jax.numpy as jnp
from jax.experimental import pallas as pl
from jax.experimental.pallas import tpu as pltpu


def _round_up(v, m):
    return (v + m - 1) // m * m


def _pad_last2(a, r, c):
    pads = [(0, 0)] * (a.ndim - 2) + [(0, r - a.shape[-2]), (0, c - a.shape[-1])]
    return jnp.pad(a, pads)


# --------------------------------------------------------------------------
# Kernel: one grid step == one GIN layer; h / pooled reps carried in VMEM.
# --------------------------------------------------------------------------
def ginjk_kernel(num_layers, num_classes,
                 # layer-invariant inputs, left in HBM (memory_space=pl.ANY)
                 x_hbm, g_hbm, s_hbm, invdeg_hbm, eattr_hbm,
                 pool_hbm, invcnt_hbm, wp_hbm,
                 # per-layer streamed weights (auto-pipelined)
                 we_ref, be_ref, w1_ref, b1_ref, w2_ref, b2_ref, eps_ref, bp_ref,
                 # output
                 out_ref,
                 # scratch
                 h_scr, hbf_scr, g_scr, s_scr, invdeg_scr, eattr_scr,
                 pool_scr, invcnt_scr, wp_scr, pooled_scr):
    l = pl.program_id(0)

    @pl.when(l == 0)
    def _init():
        # Single-buffered, one-time copies of the layer-invariant operands.
        pltpu.sync_copy(x_hbm, h_scr)            # x goes straight into h carry
        pltpu.sync_copy(g_hbm, g_scr)
        pltpu.sync_copy(s_hbm, s_scr)
        pltpu.sync_copy(invdeg_hbm, invdeg_scr)
        pltpu.sync_copy(eattr_hbm, eattr_scr)
        pltpu.sync_copy(pool_hbm, pool_scr)
        pltpu.sync_copy(invcnt_hbm, invcnt_scr)
        pltpu.sync_copy(wp_hbm, wp_scr)
        hbf_scr[...] = h_scr[...].astype(jnp.bfloat16)

    h = h_scr[...]                                 # [Np, Hp] f32
    h_bf = hbf_scr[...]                            # [Np, Hp] bf16 (cached cast)

    # edge_encoder: Linear(1, H) applied to edge_attr [E, 1]
    edge_emb = eattr_scr[...] * we_ref[0] + be_ref[0]      # [Ep, Hp] f32

    # message(x_j, edge_attr) = relu(x_j + edge_emb); gather x_j = G @ h (MXU, bf16)
    xj = jnp.dot(g_scr[...], h_bf, preferred_element_type=jnp.float32)   # [Ep, Hp]
    msg = jnp.maximum(xj + edge_emb, 0.0).astype(jnp.bfloat16)

    # aggr='mean': scatter-add via exact one-hot S (bf16), then f32 1/deg scale.
    agg = jnp.dot(s_scr[...], msg, preferred_element_type=jnp.float32)   # [Np, Hp]
    agg = agg * invdeg_scr[...]

    combined = ((1.0 + eps_ref[l]) * h + agg).astype(jnp.bfloat16)

    # mlp: Linear -> ReLU -> Linear, plus the outer ReLU from GINJKFlag_node
    h1 = jnp.maximum(
        jnp.dot(combined, w1_ref[0], preferred_element_type=jnp.float32)
        + b1_ref[0], 0.0)
    h2 = (jnp.dot(h1.astype(jnp.bfloat16), w2_ref[0],
                  preferred_element_type=jnp.float32) + b2_ref[0])
    h_new = jnp.maximum(h2, 0.0)                  # h_list[l], f32

    h_scr[...] = h_new
    hbf_scr[...] = h_new.astype(jnp.bfloat16)     # reused as next layer's gather feed

    # global_mean_pool of this layer's node rep (kept in f32 for the JK head)
    pooled = jnp.dot(pool_scr[...], h_new, preferred_element_type=jnp.float32)
    pooled_scr[l] = pooled * invcnt_scr[...]      # [Bp, Hp]

    @pl.when(l == num_layers - 1)
    def _fin():
        # JK concat -> single head matmul (K = L*Hp) -> log_softmax, all f32.
        parts = [pooled_scr[i] for i in range(num_layers)]
        cat = jnp.concatenate(parts, axis=-1)                     # [Bp, L*Hp]
        logits = (jnp.dot(cat, wp_scr[...],
                          preferred_element_type=jnp.float32) + bp_ref[...])
        col = jax.lax.broadcasted_iota(jnp.int32, logits.shape, 1)
        logits = jnp.where(col < num_classes, logits, -1e30)      # mask padded classes
        m = jnp.max(logits, axis=-1, keepdims=True)
        z = logits - m
        lse = jnp.log(jnp.sum(jnp.exp(z), axis=-1, keepdims=True))
        out_ref[...] = (z - lse).astype(out_ref.dtype)


# --------------------------------------------------------------------------
# pallas_call wrapper
# --------------------------------------------------------------------------
def ginjk_forward(x, gmat, smat, inv_deg, edge_attr, pool, inv_cnt, kp, num_classes):
    L, _, Hp = kp["be"].shape
    Np = x.shape[0]
    Ep = gmat.shape[0]
    Bp = pool.shape[0]
    Cp = kp["bp"].shape[-1]

    anyspec = pl.BlockSpec(memory_space=pl.ANY)        # stays in HBM, manual DMA
    in_specs = [anyspec] * 8 + [
        pl.BlockSpec((1, 1, Hp), lambda l: (l, 0, 0)),     # we  (per layer)
        pl.BlockSpec((1, 1, Hp), lambda l: (l, 0, 0)),     # be
        pl.BlockSpec((1, Hp, Hp), lambda l: (l, 0, 0)),    # w1  (bf16)
        pl.BlockSpec((1, 1, Hp), lambda l: (l, 0, 0)),     # b1
        pl.BlockSpec((1, Hp, Hp), lambda l: (l, 0, 0)),    # w2  (bf16)
        pl.BlockSpec((1, 1, Hp), lambda l: (l, 0, 0)),     # b2
        pl.BlockSpec(memory_space=pltpu.MemorySpace.SMEM), # eps [L] in SMEM
        pl.BlockSpec((1, Cp), lambda l: (0, 0)),           # bp
    ]

    scratch_shapes = [
        pltpu.VMEM((Np, Hp), jnp.float32),      # h carry (f32)
        pltpu.VMEM((Np, Hp), jnp.bfloat16),     # h bf16 cache (MXU feed)
        pltpu.VMEM((Ep, Np), jnp.bfloat16),     # gather one-hot
        pltpu.VMEM((Np, Ep), jnp.bfloat16),     # scatter one-hot
        pltpu.VMEM((Np, 1), jnp.float32),       # 1/deg
        pltpu.VMEM((Ep, 1), jnp.float32),       # edge_attr
        pltpu.VMEM((Bp, Np), jnp.float32),      # pool one-hot (f32 head path)
        pltpu.VMEM((Bp, 1), jnp.float32),       # 1/|graph|
        pltpu.VMEM((L * Hp, Cp), jnp.float32),  # graph_pred_linear weight
        pltpu.VMEM((L, Bp, Hp), jnp.float32),   # per-layer pooled reps (JK)
    ]

    grid_spec = pltpu.PrefetchScalarGridSpec(
        num_scalar_prefetch=0,
        grid=(L,),
        in_specs=in_specs,
        out_specs=pl.BlockSpec((Bp, Cp), lambda l: (0, 0)),
        scratch_shapes=scratch_shapes,
    )

    # Advisory cost estimate for the XLA scheduler.
    flops = L * (2 * Ep * Np * Hp           # gather one-hot matmul
                 + 2 * Np * Ep * Hp         # scatter one-hot matmul
                 + 4 * Np * Hp * Hp         # 2-layer MLP
                 + 2 * Bp * Np * Hp)        # pool one-hot matmul
    flops += 2 * Bp * (L * Hp) * Cp         # JK head
    inputs = (x, gmat, smat, inv_deg, edge_attr, pool, inv_cnt,
              kp["wp"], kp["we"], kp["be"], kp["w1"], kp["b1"],
              kp["w2"], kp["b2"], kp["eps"], kp["bp"])
    bytes_accessed = sum(int(a.size) * a.dtype.itemsize for a in inputs) + Bp * Cp * 4
    cost = pl.CostEstimate(flops=int(flops), transcendentals=int(Bp * Cp),
                           bytes_accessed=int(bytes_accessed))

    # VMEM budget derived from actual buffers (scratch + 2x streamed weights),
    # clamped to <= 48 MiB so the same config also fits v7x's 64 MiB VMEM.
    f4, b2 = 4, 2
    scratch_bytes = (Np * Hp * f4 + Np * Hp * b2 + Ep * Np * b2 + Np * Ep * b2
                     + Np * f4 + Ep * f4 + Bp * Np * f4 + Bp * f4
                     + L * Hp * Cp * f4 + L * Bp * Hp * f4)
    streamed_bytes = 2 * (2 * Hp * Hp * b2 + 4 * Hp * f4 + Cp * f4)
    need = scratch_bytes + streamed_bytes + Bp * Cp * f4
    vmem_limit = int(min(max(4 * need, 16 * 1024 * 1024), 48 * 1024 * 1024))

    kernel = functools.partial(ginjk_kernel, L, num_classes)
    return pl.pallas_call(
        kernel,
        out_shape=jax.ShapeDtypeStruct((Bp, Cp), jnp.float32),
        grid_spec=grid_spec,
        compiler_params=pltpu.CompilerParams(
            dimension_semantics=("arbitrary",),     # layer axis is sequential
            vmem_limit_bytes=vmem_limit),
        cost_estimate=cost,
    )(x, gmat, smat, inv_deg, edge_attr, pool, inv_cnt, kp["wp"],
      kp["we"], kp["be"], kp["w1"], kp["b1"], kp["w2"], kp["b2"],
      kp["eps"], kp["bp"])


# --------------------------------------------------------------------------
# Glue: dense graph matrices (padded; bf16 one-hots + separate f32 scales)
# --------------------------------------------------------------------------
def build_graph_mats(edge_index, batch, num_nodes, Np, Ep, Bp):
    src, dst = edge_index[0], edge_index[1]
    E = src.shape[0]
    eidx = jnp.arange(E)

    g = jnp.zeros((Ep, Np), jnp.float32).at[eidx, src].set(1.0)
    s = jnp.zeros((Np, Ep), jnp.float32).at[dst, eidx].set(1.0)
    deg = jnp.zeros((Np,), jnp.float32).at[dst].add(1.0)
    inv_deg = (1.0 / jnp.maximum(deg, 1.0))[:, None]          # mean aggr; 0 if isolated

    nidx = jnp.arange(num_nodes)
    p = jnp.zeros((Bp, Np), jnp.float32).at[batch, nidx].set(1.0)
    cnt = jnp.zeros((Bp,), jnp.float32).at[batch].add(1.0)
    inv_cnt = (1.0 / jnp.maximum(cnt, 1.0))[:, None]

    return (g.astype(jnp.bfloat16), s.astype(jnp.bfloat16), inv_deg, p, inv_cnt)


# --------------------------------------------------------------------------
# Parameters (PyTorch layouts) + packing (transpose, zero-pad, bf16 MLP weights)
# --------------------------------------------------------------------------
def init_pt_params(key, hidden, num_classes, num_layers):
    ks = jax.random.split(key, 8)
    H, C, L = hidden, num_classes, num_layers
    sc = 0.1
    return dict(
        we=sc * jax.random.normal(ks[0], (L, H, 1), jnp.float32),   # edge_encoder.weight
        be=sc * jax.random.normal(ks[1], (L, H), jnp.float32),
        w1=sc * jax.random.normal(ks[2], (L, H, H), jnp.float32),   # mlp[0].weight
        b1=sc * jax.random.normal(ks[3], (L, H), jnp.float32),
        w2=sc * jax.random.normal(ks[4], (L, H, H), jnp.float32),   # mlp[2].weight
        b2=sc * jax.random.normal(ks[5], (L, H), jnp.float32),
        eps=jnp.zeros((L,), jnp.float32),                           # nn.Parameter([0])
        wp=sc * jax.random.normal(ks[6], (C, L * H), jnp.float32),  # graph_pred_linear
        bp=sc * jax.random.normal(ks[7], (C,), jnp.float32),
    )


def pack_params(pt, Hp, Cp):
    L, H = pt["b1"].shape
    C = pt["bp"].shape[0]
    we = jnp.pad(jnp.transpose(pt["we"], (0, 2, 1)), ((0, 0), (0, 0), (0, Hp - H)))
    be = jnp.pad(pt["be"], ((0, 0), (0, Hp - H)))[:, None, :]
    b1 = jnp.pad(pt["b1"], ((0, 0), (0, Hp - H)))[:, None, :]
    b2 = jnp.pad(pt["b2"], ((0, 0), (0, Hp - H)))[:, None, :]
    w1 = _pad_last2(jnp.transpose(pt["w1"], (0, 2, 1)), Hp, Hp).astype(jnp.bfloat16)
    w2 = _pad_last2(jnp.transpose(pt["w2"], (0, 2, 1)), Hp, Hp).astype(jnp.bfloat16)
    # head weight as one [L*Hp, Cp] f32 matrix (row l*Hp+h <-> pt wp column l*H+h)
    wp = jnp.transpose(pt["wp"], (1, 0)).reshape(L, H, C)
    wp = _pad_last2(wp, Hp, Cp).reshape(L * Hp, Cp)
    bp = jnp.pad(pt["bp"], (0, Cp - C))[None, :]
    return dict(we=we, be=be, w1=w1, b1=b1, w2=w2, b2=b2,
                eps=pt["eps"], wp=wp, bp=bp)


# --------------------------------------------------------------------------
# Pure-JAX reference (mirrors the PyTorch module exactly, f32)
# --------------------------------------------------------------------------
def reference_forward(x, edge_index, edge_attr, batch, pt, num_graphs):
    src, dst = edge_index[0], edge_index[1]
    N = x.shape[0]
    L = pt["w1"].shape[0]
    h = x
    hs = []
    for l in range(L):
        edge_emb = edge_attr @ pt["we"][l].T + pt["be"][l]
        msg = jax.nn.relu(h[src] + edge_emb)
        deg = jnp.zeros((N,), jnp.float32).at[dst].add(1.0)
        agg = jnp.zeros_like(h).at[dst].add(msg) / jnp.maximum(deg, 1.0)[:, None]
        combined = (1.0 + pt["eps"][l]) * h + agg
        h1 = jax.nn.relu(combined @ pt["w1"][l].T + pt["b1"][l])
        h2 = h1 @ pt["w2"][l].T + pt["b2"][l]
        h = jax.nn.relu(h2)
        hs.append(h)
    node_rep = jnp.concatenate(hs, axis=1)
    cnt = jnp.zeros((num_graphs,), jnp.float32).at[batch].add(1.0)
    pooled = (jnp.zeros((num_graphs, node_rep.shape[1]), jnp.float32)
              .at[batch].add(node_rep)) / jnp.maximum(cnt, 1.0)[:, None]
    logits = pooled @ pt["wp"].T + pt["bp"]
    return jax.nn.log_softmax(logits, axis=-1)


if __name__ == "__main__":
    # num_features == hidden (required by the module), 4 layers, 2 graphs.
    N, E, H, L, B, C = 16, 32, 32, 4, 2, 4
    Hp, Cp = _round_up(H, 128), _round_up(C, 128)
    Np, Ep, Bp = _round_up(N, 128), _round_up(E, 128), _round_up(B, 8)

    key = jax.random.PRNGKey(0)
    kx, ksrc, kdst, kattr, kparam = jax.random.split(key, 5)

    x = jax.random.normal(kx, (N, H), jnp.float32)                 # node features
    src = jax.random.randint(ksrc, (E,), 0, N)
    dst = jax.random.randint(kdst, (E,), 0, N)
    edge_index = jnp.stack([src, dst], axis=0)                     # [2, E]
    edge_attr = jax.random.normal(kattr, (E, 1), jnp.float32)      # [E, 1]
    batch = jnp.concatenate([jnp.zeros((N // 2,), jnp.int32),
                             jnp.ones((N - N // 2,), jnp.int32)])  # [N]

    pt = init_pt_params(kparam, H, C, L)

    # Pack / pad everything for the kernel (lane-dense 128 padding).
    gmat, smat, inv_deg, pool, inv_cnt = build_graph_mats(edge_index, batch, N, Np, Ep, Bp)
    kp = pack_params(pt, Hp, Cp)
    x_p = jnp.pad(x, ((0, Np - N), (0, Hp - H)))
    eattr_p = jnp.pad(edge_attr, ((0, Ep - E), (0, 0)))

    out_pad = ginjk_forward(x_p, gmat, smat, inv_deg, eattr_p, pool, inv_cnt, kp, C)
    out_pad = jax.block_until_ready(out_pad)
    out = out_pad[:B, :C]

    ref = reference_forward(x, edge_index, edge_attr, batch, pt, B)

    assert out.shape == (B, C)
    assert bool(jnp.all(jnp.isfinite(out)))
    assert bool(jnp.allclose(jnp.sum(jnp.exp(out), axis=-1), 1.0, atol=1e-3))
    assert bool(jnp.allclose(out, ref, atol=7e-2, rtol=0.0)), (out, ref)
    print("KERNEL_OK")
</pallas_src>

<mosaic_0001>
module attributes {stable_mosaic.version = 11 : i64} {
  func.func @ginjk_kernel(%arg0: i32, %arg1: memref<128x128xf32, #tpu.memory_space<any>>, %arg2: memref<128x128xbf16, #tpu.memory_space<any>>, %arg3: memref<128x128xbf16, #tpu.memory_space<any>>, %arg4: memref<128x1xf32, #tpu.memory_space<any>>, %arg5: memref<128x1xf32, #tpu.memory_space<any>>, %arg6: memref<8x128xf32, #tpu.memory_space<any>>, %arg7: memref<8x1xf32, #tpu.memory_space<any>>, %arg8: memref<512x128xf32, #tpu.memory_space<any>>, %arg9: memref<1x1x128xf32, #tpu.memory_space<vmem>>, %arg10: memref<1x1x128xf32, #tpu.memory_space<vmem>>, %arg11: memref<1x128x128xbf16, #tpu.memory_space<vmem>>, %arg12: memref<1x1x128xf32, #tpu.memory_space<vmem>>, %arg13: memref<1x128x128xbf16, #tpu.memory_space<vmem>>, %arg14: memref<1x1x128xf32, #tpu.memory_space<vmem>>, %arg15: memref<4xf32, #tpu.memory_space<smem>>, %arg16: memref<1x128xf32, #tpu.memory_space<vmem>>, %arg17: memref<8x128xf32, #tpu.memory_space<vmem>>, %arg18: memref<128x128xf32, #tpu.memory_space<vmem>>, %arg19: memref<128x128xbf16, #tpu.memory_space<vmem>>, %arg20: memref<128x128xbf16, #tpu.memory_space<vmem>>, %arg21: memref<128x128xbf16, #tpu.memory_space<vmem>>, %arg22: memref<128x1xf32, #tpu.memory_space<vmem>>, %arg23: memref<128x1xf32, #tpu.memory_space<vmem>>, %arg24: memref<8x128xf32, #tpu.memory_space<vmem>>, %arg25: memref<8x1xf32, #tpu.memory_space<vmem>>, %arg26: memref<512x128xf32, #tpu.memory_space<vmem>>, %arg27: memref<4x8x128xf32, #tpu.memory_space<vmem>>) attributes {dimension_semantics = [#tpu.dimension_semantics<arbitrary>], iteration_bounds = array<i64: 4>, scalar_prefetch = 0 : i64, scratch_operands = 10 : i64, tpu.core_type = #tpu.core_type<tc>, window_params = [{}, {}, {}, {}, {}, {}, {}, {}, {transform_indices = @transform_8, window_bounds = array<i64: 1, 1, 128>}, {transform_indices = @transform_9, window_bounds = array<i64: 1, 1, 128>}, {transform_indices = @transform_10, window_bounds = array<i64: 1, 128, 128>}, {transform_indices = @transform_11, window_bounds = array<i64: 1, 1, 128>}, {transform_indices = @transform_12, window_bounds = array<i64: 1, 128, 128>}, {transform_indices = @transform_13, window_bounds = array<i64: 1, 1, 128>}, {transform_indices = @transform_14, window_bounds = array<i64: 4>}, {pipeline_mode = #tpu.pipeline_mode<synchronous>, transform_indices = @transform_15, window_bounds = array<i64: 1, 128>}, {pipeline_mode = #tpu.pipeline_mode<synchronous>, transform_indices = @transform_16, window_bounds = array<i64: 8, 128>}]} {
    %c0_i32 = arith.constant 0 : i32
    %0 = arith.cmpi eq, %arg0, %c0_i32 : i32
    %1 = arith.extui %0 : i1 to i32
    %c0_i32_0 = arith.constant 0 : i32
    %2 = arith.cmpi ne, %1, %c0_i32_0 : i32
    scf.if %2 {
      "tpu.region"() ({
        %70 = tpu.sem_alloc : memref<!tpu.dma_semaphore, #tpu.memory_space<semaphore_mem>>
        tpu.enqueue_dma source(%arg1 : memref<128x128xf32, #tpu.memory_space<any>>) target(%arg18 : memref<128x128xf32, #tpu.memory_space<vmem>>) target_semaphore(%70 : memref<!tpu.dma_semaphore, #tpu.memory_space<semaphore_mem>>)
        tpu.wait_dma2 semaphore(%70 : memref<!tpu.dma_semaphore, #tpu.memory_space<semaphore_mem>>) src(%arg1 : memref<128x128xf32, #tpu.memory_space<any>>) dst(%arg18 : memref<128x128xf32, #tpu.memory_space<vmem>>)
        tpu.yield
      }) : () -> ()
      "tpu.region"() ({
        %70 = tpu.sem_alloc : memref<!tpu.dma_semaphore, #tpu.memory_space<semaphore_mem>>
        tpu.enqueue_dma source(%arg2 : memref<128x128xbf16, #tpu.memory_space<any>>) target(%arg20 : memref<128x128xbf16, #tpu.memory_space<vmem>>) target_semaphore(%70 : memref<!tpu.dma_semaphore, #tpu.memory_space<semaphore_mem>>)
        tpu.wait_dma2 semaphore(%70 : memref<!tpu.dma_semaphore, #tpu.memory_space<semaphore_mem>>) src(%arg2 : memref<128x128xbf16, #tpu.memory_space<any>>) dst(%arg20 : memref<128x128xbf16, #tpu.memory_space<vmem>>)
        tpu.yield
      }) : () -> ()
      "tpu.region"() ({
        %70 = tpu.sem_alloc : memref<!tpu.dma_semaphore, #tpu.memory_space<semaphore_mem>>
        tpu.enqueue_dma source(%arg3 : memref<128x128xbf16, #tpu.memory_space<any>>) target(%arg21 : memref<128x128xbf16, #tpu.memory_space<vmem>>) target_semaphore(%70 : memref<!tpu.dma_semaphore, #tpu.memory_space<semaphore_mem>>)
        tpu.wait_dma2 semaphore(%70 : memref<!tpu.dma_semaphore, #tpu.memory_space<semaphore_mem>>) src(%arg3 : memref<128x128xbf16, #tpu.memory_space<any>>) dst(%arg21 : memref<128x128xbf16, #tpu.memory_space<vmem>>)
        tpu.yield
      }) : () -> ()
      "tpu.region"() ({
        %70 = tpu.sem_alloc : memref<!tpu.dma_semaphore, #tpu.memory_space<semaphore_mem>>
        tpu.enqueue_dma source(%arg4 : memref<128x1xf32, #tpu.memory_space<any>>) target(%arg22 : memref<128x1xf32, #tpu.memory_space<vmem>>) target_semaphore(%70 : memref<!tpu.dma_semaphore, #tpu.memory_space<semaphore_mem>>)
        tpu.wait_dma2 semaphore(%70 : memref<!tpu.dma_semaphore, #tpu.memory_space<semaphore_mem>>) src(%arg4 : memref<128x1xf32, #tpu.memory_space<any>>) dst(%arg22 : memref<128x1xf32, #tpu.memory_space<vmem>>)
        tpu.yield
      }) : () -> ()
      "tpu.region"() ({
        %70 = tpu.sem_alloc : memref<!tpu.dma_semaphore, #tpu.memory_space<semaphore_mem>>
        tpu.enqueue_dma source(%arg5 : memref<128x1xf32, #tpu.memory_space<any>>) target(%arg23 : memref<128x1xf32, #tpu.memory_space<vmem>>) target_semaphore(%70 : memref<!tpu.dma_semaphore, #tpu.memory_space<semaphore_mem>>)
        tpu.wait_dma2 semaphore(%70 : memref<!tpu.dma_semaphore, #tpu.memory_space<semaphore_mem>>) src(%arg5 : memref<128x1xf32, #tpu.memory_space<any>>) dst(%arg23 : memref<128x1xf32, #tpu.memory_space<vmem>>)
        tpu.yield
      }) : () -> ()
      "tpu.region"() ({
        %70 = tpu.sem_alloc : memref<!tpu.dma_semaphore, #tpu.memory_space<semaphore_mem>>
        tpu.enqueue_dma source(%arg6 : memref<8x128xf32, #tpu.memory_space<any>>) target(%arg24 : memref<8x128xf32, #tpu.memory_space<vmem>>) target_semaphore(%70 : memref<!tpu.dma_semaphore, #tpu.memory_space<semaphore_mem>>)
        tpu.wait_dma2 semaphore(%70 : memref<!tpu.dma_semaphore, #tpu.memory_space<semaphore_mem>>) src(%arg6 : memref<8x128xf32, #tpu.memory_space<any>>) dst(%arg24 : memref<8x128xf32, #tpu.memory_space<vmem>>)
        tpu.yield
      }) : () -> ()
      "tpu.region"() ({
        %70 = tpu.sem_alloc : memref<!tpu.dma_semaphore, #tpu.memory_space<semaphore_mem>>
        tpu.enqueue_dma source(%arg7 : memref<8x1xf32, #tpu.memory_space<any>>) target(%arg25 : memref<8x1xf32, #tpu.memory_space<vmem>>) target_semaphore(%70 : memref<!tpu.dma_semaphore, #tpu.memory_space<semaphore_mem>>)
        tpu.wait_dma2 semaphore(%70 : memref<!tpu.dma_semaphore, #tpu.memory_space<semaphore_mem>>) src(%arg7 : memref<8x1xf32, #tpu.memory_space<any>>) dst(%arg25 : memref<8x1xf32, #tpu.memory_space<vmem>>)
        tpu.yield
      }) : () -> ()
      "tpu.region"() ({
        %70 = tpu.sem_alloc : memref<!tpu.dma_semaphore, #tpu.memory_space<semaphore_mem>>
        tpu.enqueue_dma source(%arg8 : memref<512x128xf32, #tpu.memory_space<any>>) target(%arg26 : memref<512x128xf32, #tpu.memory_space<vmem>>) target_semaphore(%70 : memref<!tpu.dma_semaphore, #tpu.memory_space<semaphore_mem>>)
        tpu.wait_dma2 semaphore(%70 : memref<!tpu.dma_semaphore, #tpu.memory_space<semaphore_mem>>) src(%arg8 : memref<512x128xf32, #tpu.memory_space<any>>) dst(%arg26 : memref<512x128xf32, #tpu.memory_space<vmem>>)
        tpu.yield
      }) : () -> ()
      %c0_49 = arith.constant 0 : index
      %c0_50 = arith.constant 0 : index
      %67 = vector.load %arg18[%c0_49, %c0_50] : memref<128x128xf32, #tpu.memory_space<vmem>>, vector<128x128xf32>
      %68 = arith.truncf %67 : vector<128x128xf32> to vector<128x128xbf16>
      %c0_51 = arith.constant 0 : index
      %c0_52 = arith.constant 0 : index
      %69 = vector.load %arg19[%c0_51, %c0_52] : memref<128x128xbf16, #tpu.memory_space<vmem>>, vector<128x128xbf16>
      tpu.vector_store %arg19[%c0_51, %c0_52], %68 {strides = array<i32>} : memref<128x128xbf16, #tpu.memory_space<vmem>>, vector<128x128xbf16>,
    } else {
    }
    %c0 = arith.constant 0 : index
    %c0_1 = arith.constant 0 : index
    %3 = vector.load %arg18[%c0, %c0_1] : memref<128x128xf32, #tpu.memory_space<vmem>>, vector<128x128xf32>
    %c0_2 = arith.constant 0 : index
    %c0_3 = arith.constant 0 : index
    %4 = vector.load %arg19[%c0_2, %c0_3] : memref<128x128xbf16, #tpu.memory_space<vmem>>, vector<128x128xbf16>
    %c0_4 = arith.constant 0 : index
    %c0_5 = arith.constant 0 : index
    %5 = vector.load %arg23[%c0_4, %c0_5] : memref<128x1xf32, #tpu.memory_space<vmem>>, vector<128x1xf32>
    %c0_6 = arith.constant 0 : index
    %c0_7 = arith.constant 0 : index
    %c0_8 = arith.constant 0 : index
    %6 = vector.load %arg9[%c0_6, %c0_7, %c0_8] : memref<1x1x128xf32, #tpu.memory_space<vmem>>, vector<1x1x128xf32>
    %7 = vector.shape_cast %6 : vector<1x1x128xf32> to vector<1x128xf32>
    %8 = vector.broadcast %5 : vector<128x1xf32> to vector<128x128xf32>
    %9 = vector.broadcast %7 : vector<1x128xf32> to vector<128x128xf32>
    %10 = arith.mulf %8, %9 : vector<128x128xf32>
    %c0_9 = arith.constant 0 : index
    %c0_10 = arith.constant 0 : index
    %c0_11 = arith.constant 0 : index
    %11 = vector.load %arg10[%c0_9, %c0_10, %c0_11] : memref<1x1x128xf32, #tpu.memory_space<vmem>>, vector<1x1x128xf32>
    %12 = vector.shape_cast %11 : vector<1x1x128xf32> to vector<1x128xf32>
    %13 = vector.broadcast %12 : vector<1x128xf32> to vector<128x128xf32>
    %14 = arith.addf %10, %13 : vector<128x128xf32>
    %c0_12 = arith.constant 0 : index
    %c0_13 = arith.constant 0 : index
    %15 = vector.load %arg20[%c0_12, %c0_13] : memref<128x128xbf16, #tpu.memory_space<vmem>>, vector<128x128xbf16>
    %cst = arith.constant dense<0.000000e+00> : vector<128x128xf32>
    %16 = tpu.matmul %15, %4, %cst {dimension_numbers = #tpu.dot_dimension_numbers<[1], [0], [0], [1], [0, 0, 1, 1], [], []>} : vector<128x128xbf16>, vector<128x128xbf16>, vector<128x128xf32> -> vector<128x128xf32>
    %17 = arith.addf %16, %14 : vector<128x128xf32>
    %cst_14 = arith.constant 0.000000e+00 : f32
    %18 = vector.broadcast %cst_14 : f32 to vector<128x128xf32>
    %19 = arith.maximumf %17, %18 : vector<128x128xf32>
    %20 = arith.truncf %19 : vector<128x128xf32> to vector<128x128xbf16>
    %c0_15 = arith.constant 0 : index
    %c0_16 = arith.constant 0 : index
    %21 = vector.load %arg21[%c0_15, %c0_16] : memref<128x128xbf16, #tpu.memory_space<vmem>>, vector<128x128xbf16>
    %cst_17 = arith.constant dense<0.000000e+00> : vector<128x128xf32>
    %22 = tpu.matmul %21, %20, %cst_17 {dimension_numbers = #tpu.dot_dimension_numbers<[1], [0], [0], [1], [0, 0, 1, 1], [], []>} : vector<128x128xbf16>, vector<128x128xbf16>, vector<128x128xf32> -> vector<128x128xf32>
    %c0_18 = arith.constant 0 : index
    %c0_19 = arith.constant 0 : index
    %23 = vector.load %arg22[%c0_18, %c0_19] : memref<128x1xf32, #tpu.memory_space<vmem>>, vector<128x1xf32>
    %24 = vector.broadcast %23 : vector<128x1xf32> to vector<128x128xf32>
    %25 = arith.mulf %22, %24 : vector<128x128xf32>
    %26 = arith.index_cast %arg0 : i32 to index
    %27 = memref.load %arg15[%26] : memref<4xf32, #tpu.memory_space<smem>>
    %cst_20 = arith.constant 1.000000e+00 : f32
    %28 = arith.addf %cst_20, %27 : f32
    %29 = vector.broadcast %28 : f32 to vector<128x128xf32>
    %30 = arith.mulf %29, %3 : vector<128x128xf32>
    %31 = arith.addf %30, %25 : vector<128x128xf32>
    %32 = arith.truncf %31 : vector<128x128xf32> to vector<128x128xbf16>
    %c0_21 = arith.constant 0 : index
    %c0_22 = arith.constant 0 : index
    %c0_23 = arith.constant 0 : index
    %33 = vector.load %arg11[%c0_21, %c0_22, %c0_23] : memref<1x128x128xbf16, #tpu.memory_space<vmem>>, vector<1x128x128xbf16>
    %34 = vector.shape_cast %33 : vector<1x128x128xbf16> to vector<128x128xbf16>
    %cst_24 = arith.constant dense<0.000000e+00> : vector<128x128xf32>
    %35 = tpu.matmul %32, %34, %cst_24 {dimension_numbers = #tpu.dot_dimension_numbers<[1], [0], [0], [1], [0, 0, 1, 1], [], []>} : vector<128x128xbf16>, vector<128x128xbf16>, vector<128x128xf32> -> vector<128x128xf32>
    %c0_25 = arith.constant 0 : index
    %c0_26 = arith.constant 0 : index
    %c0_27 = arith.constant 0 : index
    %36 = vector.load %arg12[%c0_25, %c0_26, %c0_27] : memref<1x1x128xf32, #tpu.memory_space<vmem>>, vector<1x1x128xf32>
    %37 = vector.shape_cast %36 : vector<1x1x128xf32> to vector<1x128xf32>
    %38 = vector.broadcast %37 : vector<1x128xf32> to vector<128x128xf32>
    %39 = arith.addf %35, %38 : vector<128x128xf32>
    %cst_28 = arith.constant 0.000000e+00 : f32
    %40 = vector.broadcast %cst_28 : f32 to vector<128x128xf32>
    %41 = arith.maximumf %39, %40 : vector<128x128xf32>
    %42 = arith.truncf %41 : vector<128x128xf32> to vector<128x128xbf16>
    %c0_29 = arith.constant 0 : index
    %c0_30 = arith.constant 0 : index
    %c0_31 = arith.constant 0 : index
    %43 = vector.load %arg13[%c0_29, %c0_30, %c0_31] : memref<1x128x128xbf16, #tpu.memory_space<vmem>>, vector<1x128x128xbf16>
    %44 = vector.shape_cast %43 : vector<1x128x128xbf16> to vector<128x128xbf16>
    %cst_32 = arith.constant dense<0.000000e+00> : vector<128x128xf32>
    %45 = tpu.matmul %42, %44, %cst_32 {dimension_numbers = #tpu.dot_dimension_numbers<[1], [0], [0], [1], [0, 0, 1, 1], [], []>} : vector<128x128xbf16>, vector<128x128xbf16>, vector<128x128xf32> -> vector<128x128xf32>
    %c0_33 = arith.constant 0 : index
    %c0_34 = arith.constant 0 : index
    %c0_35 = arith.constant 0 : index
    %46 = vector.load %arg14[%c0_33, %c0_34, %c0_35] : memref<1x1x128xf32, #tpu.memory_space<vmem>>, vector<1x1x128xf32>
    %47 = vector.shape_cast %46 : vector<1x1x128xf32> to vector<1x128xf32>
    %48 = vector.broadcast %47 : vector<1x128xf32> to vector<128x128xf32>
    %49 = arith.addf %45, %48 : vector<128x128xf32>
    %cst_36 = arith.constant 0.000000e+00 : f32
    %50 = vector.broadcast %cst_36 : f32 to vector<128x128xf32>
    %51 = arith.maximumf %49, %50 : vector<128x128xf32>
    %c0_37 = arith.constant 0 : index
    %c0_38 = arith.constant 0 : index
    %52 = vector.load %arg18[%c0_37, %c0_38] : memref<128x128xf32, #tpu.memory_space<vmem>>, vector<128x128xf32>
    tpu.vector_store %arg18[%c0_37, %c0_38], %51 {strides = array<i32>} : memref<128x128xf32, #tpu.memory_space<vmem>>, vector<128x128xf32>,
    %53 = arith.truncf %51 : vector<128x128xf32> to vector<128x128xbf16>
    %c0_39 = arith.constant 0 : index
    %c0_40 = arith.constant 0 : index
    %54 = vector.load %arg19[%c0_39, %c0_40] : memref<128x128xbf16, #tpu.memory_space<vmem>>, vector<128x128xbf16>
    tpu.vector_store %arg19[%c0_39, %c0_40], %53 {strides = array<i32>} : memref<128x128xbf16, #tpu.memory_space<vmem>>, vector<128x128xbf16>,
    %c0_41 = arith.constant 0 : index
    %c0_42 = arith.constant 0 : index
    %55 = vector.load %arg24[%c0_41, %c0_42] : memref<8x128xf32, #tpu.memory_space<vmem>>, vector<8x128xf32>
    %cst_43 = arith.constant dense<0.000000e+00> : vector<8x128xf32>
    %56 = tpu.matmul %55, %51, %cst_43 {dimension_numbers = #tpu.dot_dimension_numbers<[1], [0], [0], [1], [0, 0, 1, 1], [], []>} : vector<8x128xf32>, vector<128x128xf32>, vector<8x128xf32> -> vector<8x128xf32>
    %c0_44 = arith.constant 0 : index
    %c0_45 = arith.constant 0 : index
    %57 = vector.load %arg25[%c0_44, %c0_45] : memref<8x1xf32, #tpu.memory_space<vmem>>, vector<8x1xf32>
    %58 = vector.broadcast %57 : vector<8x1xf32> to vector<8x128xf32>
    %59 = arith.mulf %56, %58 : vector<8x128xf32>
    %60 = arith.index_cast %arg0 : i32 to index
    %c0_46 = arith.constant 0 : index
    %c0_47 = arith.constant 0 : index
    %61 = vector.load %arg27[%60, %c0_46, %c0_47] : memref<4x8x128xf32, #tpu.memory_space<vmem>>, vector<1x8x128xf32>
    %62 = vector.shape_cast %61 : vector<1x8x128xf32> to vector<8x128xf32>
    %63 = vector.shape_cast %59 : vector<8x128xf32> to vector<1x8x128xf32>
    tpu.vector_store %arg27[%60, %c0_46, %c0_47], %63 {strides = array<i32>} : memref<4x8x128xf32, #tpu.memory_space<vmem>>, vector<1x8x128xf32>,
    %c3_i32 = arith.constant 3 : i32
    %64 = arith.cmpi eq, %arg0, %c3_i32 : i32
    %65 = arith.extui %64 : i1 to i32
    %c0_i32_48 = arith.constant 0 : i32
    %66 = arith.cmpi ne, %65, %c0_i32_48 : i32
    scf.if %66 {
      %c0_49 = arith.constant 0 : index
      %c0_50 = arith.constant 0 : index
      %c0_51 = arith.constant 0 : index
      %67 = vector.load %arg27[%c0_49, %c0_50, %c0_51] : memref<4x8x128xf32, #tpu.memory_space<vmem>>, vector<1x8x128xf32>
      %68 = vector.shape_cast %67 : vector<1x8x128xf32> to vector<8x128xf32>
      %c1 = arith.constant 1 : index
      %c0_52 = arith.constant 0 : index
      %c0_53 = arith.constant 0 : index
      %69 = vector.load %arg27[%c1, %c0_52, %c0_53] : memref<4x8x128xf32, #tpu.memory_space<vmem>>, vector<1x8x128xf32>
      %70 = vector.shape_cast %69 : vector<1x8x128xf32> to vector<8x128xf32>
      %c2 = arith.constant 2 : index
      %c0_54 = arith.constant 0 : index
      %c0_55 = arith.constant 0 : index
      %71 = vector.load %arg27[%c2, %c0_54, %c0_55] : memref<4x8x128xf32, #tpu.memory_space<vmem>>, vector<1x8x128xf32>
      %72 = vector.shape_cast %71 : vector<1x8x128xf32> to vector<8x128xf32>
      %c3 = arith.constant 3 : index
      %c0_56 = arith.constant 0 : index
      %c0_57 = arith.constant 0 : index
      %73 = vector.load %arg27[%c3, %c0_56, %c0_57] : memref<4x8x128xf32, #tpu.memory_space<vmem>>, vector<1x8x128xf32>
      %74 = vector.shape_cast %73 : vector<1x8x128xf32> to vector<8x128xf32>
      %75 = tpu.concatenate %68, %70, %72, %74 in 1 : vector<8x128xf32>, vector<8x128xf32>, vector<8x128xf32>, vector<8x128xf32> -> vector<8x512xf32>
      %c0_58 = arith.constant 0 : index
      %c0_59 = arith.constant 0 : index
      %76 = vector.load %arg26[%c0_58, %c0_59] : memref<512x128xf32, #tpu.memory_space<vmem>>, vector<512x128xf32>
      %cst_60 = arith.constant dense<0.000000e+00> : vector<8x128xf32>
      %77 = tpu.matmul %75, %76, %cst_60 {dimension_numbers = #tpu.dot_dimension_numbers<[1], [0], [0], [1], [0, 0, 1, 1], [], []>} : vector<8x512xf32>, vector<512x128xf32>, vector<8x128xf32> -> vector<8x128xf32>
      %c0_61 = arith.constant 0 : index
      %c0_62 = arith.constant 0 : index
      %78 = vector.load %arg16[%c0_61, %c0_62] : memref<1x128xf32, #tpu.memory_space<vmem>>, vector<1x128xf32>
      %79 = vector.broadcast %78 : vector<1x128xf32> to vector<8x128xf32>
      %80 = arith.addf %77, %79 : vector<8x128xf32>
      %81 = tpu.iota {dimensions = array<i32: 1>} : vector<8x128xi32>
      %c4_i32 = arith.constant 4 : i32
      %82 = vector.broadcast %c4_i32 : i32 to vector<8x128xi32>
      %83 = arith.cmpi slt, %81, %82 : vector<8x128xi32>
      %cst_63 = arith.constant -1.000000e+30 : f32
      %84 = vector.broadcast %cst_63 : f32 to vector<8x128xf32>
      %85 = arith.select %83, %80, %84 : vector<8x128xi1>, vector<8x128xf32>
      %cst_64 = arith.constant dense<0xFF800000> : vector<8xf32>
      %86 = vector.multi_reduction <maximumf>, %85, %cst_64 [1] : vector<8x128xf32> to vector<8xf32>
      %87 = vector.shape_cast %86 : vector<8xf32> to vector<8x1xf32>
      %88 = vector.broadcast %87 : vector<8x1xf32> to vector<8x128xf32>
      %89 = arith.subf %85, %88 : vector<8x128xf32>
      %90 = math.exp %89 : vector<8x128xf32>
      %cst_65 = arith.constant dense<0.000000e+00> : vector<8xf32>
      %91 = vector.multi_reduction <add>, %90, %cst_65 [1] : vector<8x128xf32> to vector<8xf32>
      %92 = vector.shape_cast %91 : vector<8xf32> to vector<8x1xf32>
      %93 = math.log %92 : vector<8x1xf32>
      %94 = vector.broadcast %93 : vector<8x1xf32> to vector<8x128xf32>
      %95 = arith.subf %89, %94 : vector<8x128xf32>
      %c0_66 = arith.constant 0 : index
      %c0_67 = arith.constant 0 : index
      %96 = vector.load %arg17[%c0_66, %c0_67] : memref<8x128xf32, #tpu.memory_space<vmem>>, vector<8x128xf32>
      tpu.vector_store %arg17[%c0_66, %c0_67], %95 {strides = array<i32>} : memref<8x128xf32, #tpu.memory_space<vmem>>, vector<8x128xf32>,
    } else {
    }
    return
  }
  func.func @transform_8(%arg0: i32) -> (i32, i32, i32) {
    %c0_i32 = arith.constant 0 : i32
    %c0_i32_0 = arith.constant 0 : i32
    %c0_i32_1 = arith.constant 0 : i32
    return %arg0, %c0_i32, %c0_i32_0 : i32, i32, i32
  }
  func.func @transform_9(%arg0: i32) -> (i32, i32, i32) {
    %c0_i32 = arith.constant 0 : i32
    %c0_i32_0 = arith.constant 0 : i32
    %c0_i32_1 = arith.constant 0 : i32
    return %arg0, %c0_i32, %c0_i32_0 : i32, i32, i32
  }
  func.func @transform_10(%arg0: i32) -> (i32, i32, i32) {
    %c0_i32 = arith.constant 0 : i32
    %c0_i32_0 = arith.constant 0 : i32
    %c0_i32_1 = arith.constant 0 : i32
    return %arg0, %c0_i32, %c0_i32_0 : i32, i32, i32
  }
  func.func @transform_11(%arg0: i32) -> (i32, i32, i32) {
    %c0_i32 = arith.constant 0 : i32
    %c0_i32_0 = arith.constant 0 : i32
    %c0_i32_1 = arith.constant 0 : i32
    return %arg0, %c0_i32, %c0_i32_0 : i32, i32, i32
  }
  func.func @transform_12(%arg0: i32) -> (i32, i32, i32) {
    %c0_i32 = arith.constant 0 : i32
    %c0_i32_0 = arith.constant 0 : i32
    %c0_i32_1 = arith.constant 0 : i32
    return %arg0, %c0_i32, %c0_i32_0 : i32, i32, i32
  }
  func.func @transform_13(%arg0: i32) -> (i32, i32, i32) {
    %c0_i32 = arith.constant 0 : i32
    %c0_i32_0 = arith.constant 0 : i32
    %c0_i32_1 = arith.constant 0 : i32
    return %arg0, %c0_i32, %c0_i32_0 : i32, i32, i32
  }
  func.func @transform_14(%arg0: i32) -> i32 {
    %c0_i32 = arith.constant 0 : i32
    %c0_i32_0 = arith.constant 0 : i32
    return %c0_i32 : i32
  }
  func.func @transform_15(%arg0: i32) -> (i32, i32) {
    %c0_i32 = arith.constant 0 : i32
    %c0_i32_0 = arith.constant 0 : i32
    %c0_i32_1 = arith.constant 0 : i32
    return %c0_i32, %c0_i32_0 : i32, i32
  }
  func.func @transform_16(%arg0: i32) -> (i32, i32) {
    %c0_i32 = arith.constant 0 : i32
    %c0_i32_0 = arith.constant 0 : i32
    %c0_i32_1 = arith.constant 0 : i32
    return %c0_i32, %c0_i32_0 : i32, i32
  }
}

</mosaic_0001>

<bundles_post_ra>
// kernel: tpu_custom_call.1
= control target key start
LH: loop header
LB: loop body
LE: loop exit
PB: predicated region body
PF: predicated region fallthrough
CT: control target
= control target key end

     0   :  { %s3229_s0 = inlined_call_operand.hbm [shape: f32[128,128], index: 0, kind: input, shape index: {}]   ;;  %s3230_s1 = inlined_call_operand.hbm [shape: bf16[128,128], index: 1, kind: input, shape index: {}]   ;;  %s3231_s2 = inlined_call_operand.hbm [shape: bf16[128,128], index: 2, kind: input, shape index: {}]   ;;  %s3232_s3 = inlined_call_operand.vmem [shape: f32[128,1], index: 3, kind: input, shape index: {}]   ;;  %s3233_s4 = inlined_call_operand.vmem [shape: f32[128,1], index: 4, kind: input, shape index: {}]   ;;  %s3234_s5 = inlined_call_operand.vmem [shape: f32[8,128], index: 5, kind: input, shape index: {}]   ;;  %s3235_s6 = inlined_call_operand.vmem [shape: f32[8,1], index: 6, kind: input, shape index: {}]   ;;  %s3236_s7 = inlined_call_operand.hbm [shape: f32[512,128], index: 7, kind: input, shape index: {}]   ;;  %s3237_s8 = inlined_call_operand.vmem [shape: f32[4,1,128], index: 8, kind: input, shape index: {}]   ;;  %s3238_s9 = inlined_call_operand.vmem [shape: f32[4,1,128], index: 9, kind: input, shape index: {}]   ;;  %s3239_s10 = inlined_call_operand.vmem [shape: bf16[4,128,128], index: 10, kind: input, shape index: {}]   ;;  %s3240_s11 = inlined_call_operand.vmem [shape: f32[4,1,128], index: 11, kind: input, shape index: {}]   ;;  %s3241_s12 = inlined_call_operand.hbm [shape: bf16[4,128,128], index: 12, kind: input, shape index: {}]   ;;  %s3242_s13 = inlined_call_operand.hbm [shape: f32[4,1,128], index: 13, kind: input, shape index: {}]   ;;  %s3243_s14 = inlined_call_operand.vmem [shape: f32[4], index: 14, kind: input, shape index: {}]   ;;  %s3244_s15 = inlined_call_operand.vmem [shape: f32[1,128], index: 15, kind: input, shape index: {}]   ;;  %s3245_s16 = inlined_call_operand.hbm [shape: f32[8,128], index: 16, kind: output, shape index: {}]  }
   0x1   :  { %3249 = sst [smem:[#allocation57_spill]] %s3229_s0 }
   0x2   :  { %3250 = sst [smem:[#allocation58_spill]] %s3234_s5 }
   0x3   :  { %3251 = sst [smem:[#allocation59_spill]] %s3235_s6 }
   0x4   :  { %3252 = sst [smem:[#allocation60_spill]] %s3236_s7 }
   0x5   :  { %3253 = sst [smem:[#allocation61_spill]] %s3241_s12 }
   0x6   :  { %3254 = sst [smem:[#allocation62_spill]] %s3243_s14 }
   0x7   :  { %3255 = sst [smem:[#allocation63_spill]] %s3244_s15 }
   0x8   :  { %3256 = sst [smem:[#allocation64_spill]] %s3245_s16 }
   0x9   :  { %21 = vsyncpa [#allocation13], 0 }
   0xa   :  { %23 = vsyncpa [#allocation13 + $0x1], 0 }
   0xb   :  { %24 = vsyncpa [#allocation17], 0 }
   0xc   :  { %26 = vsyncpa [#allocation17 + $0x1], 0 }
   0xd   :  { %27 = vsyncpa [#allocation15], 0 }
   0xe   :  { %28 = vsyncpa [#allocation14], 0  ;;  %s2775_s21 = smov 0   ;;  %s2777_s22 = smov 0  }
   0xf   :  { %s2779_s23 = smov 0   ;;  %s2781_s24 = smov 0  }
  0x10 LB: > { %3257 = sst [smem:[#allocation54_spill]] %s2675_s23  ;;  %s2794_s25 = sadd.s32 4294967295, %s2679_s24   ;;  %s2679_s24 = sphi %s2781_s24, %s3272_s24   ;;  %s2675_s23 = sphi %s2779_s23, %s3274_s23   ;;  %s2671_s22 = sphi %s2777_s22, %s3276_s22   ;;  %s2667_s21 = sphi %s2775_s21, %s3275_s21  }
  0x11   : > { %s2797_s26 = sadd.s32 1, %s2679_s24   ;;  %s145_s28 = sadd.s32 1, %s2675_s23 }
  0x12   : > { %3258 = sst [smem:[#allocation55_spill]] %s2797_s26  ;;  %s142_s27 = ssub.s32 %s2679_s24, %s2797_s26 }
  0x13   : > { %p143_p0 = scmp.eq.s32.totalorder %s142_s27, 0  ;;  %p152_p1 = scmp.ne.s32.totalorder %s2675_s23, %s2671_s22 }
  0x14   : > { %p153_p2 = scmp.eq.s32.totalorder %s2679_s24, 0  ;;  %p158_p3 = scmp.ne.s32.totalorder %s2671_s22, %s2667_s21 }
  0x15   : > { %s2807_s29 = scalar_select %p143_p0, %s2675_s23, %s145_s28  }
  0x16   : > { %p2809_p4 = por %p153_p2, %p152_p1  ;;  %p159_p5 = scmp.eq.s32.totalorder %s2794_s25, 0 }
  0x17   : > { %3259 = sst [smem:[#allocation56_spill]] %s2807_s29  ;;  %p2023_p6 = scmp.ge.s32.totalorder %s2679_s24, 1 }
  0x18   : > { %p258_p7 = scmp.lt.s32.totalorder %s2679_s24, 5  ;;  %p2818_p8 = por %p159_p5, %p158_p3 }
  0x19   : > { %p2024_p9 = scmp.ne.s32.totalorder %s2794_s25, 0  ;;  %s3263_s14 = sld [smem:[#allocation62_spill]] }
  0x1a   : > { %p2823_p10 = pnand %p2023_p6, %p258_p7  ;;  %p2361_p12 = scmp.lt.s32.totalorder %s2679_s24, 4 }
  0x1b   : > { %s2834_s21 = sand.u32 1, %s2675_s23   ;;  %s2681_s18 = smov [#allocation18]  }
  0x1c   : > { %p2349_p11 = pneg %p2823_p10  ;;  %p2840_p0 = pnand %p2361_p12, %p2809_p4 }
  0x1d   : > { %s2026_s28 = sshll.u32 %s2834_s21, 6  ;;  %s2201_s19 = sshll.u32 %s2679_s24, 6 }
  0x1e   : > { %p2350_p13 = pnand %p2349_p11, %p159_p5  ;;  %s3265_s12 = sld [smem:[#allocation61_spill]] }
  0x1f   : > { %s270_s20 = sshll.u32 %s3263_s14, 4  ;;  %s314_s26 = scalar_lea.vmem [#allocation12], %s2026_s28  ;;  %s271_s20 = int_to_ptr.vmem [resolvable:$true] %s270_s20 }
  0x20   : > { %2352 = dma.vmem_to_smem (!%p2350_p13), %s271_s20, 16, %s2681_s18, [#allocation15]  }
  0x21   : > { %s322_s16 = sshll.u32 %s314_s26, 4  ;;  %s311_s30 = scalar_lea.sflag [#allocation13], %s2834_s21  ;;  %s323_s16 = int_to_ptr.vmem [resolvable:$true] %s322_s16 }
  0x22   : > { %p2437_p2 = pneg %p2840_p0 }
  0x24   : > { %s319_s23 = scalar_lea.hbm %s3265_s12, %s2201_s19  ;;  %s2440_s14 = scalar_lea.hbm %s3265_s12, 256 }
  0x25   : > { %s320_s15 = sshll.u32 %s319_s23, 4  ;;  %s321_s15 = int_to_ptr.hbm [resolvable:$true] %s320_s15 }
  0x26   : > { %s2433_s7 = sshra.s32 %s321_s15, 4  ;;  %s2434_s7 = int_to_ptr.hbm [resolvable:$true] %s2433_s7 }
  0x27   : > { %s2435_s6 = scalar_lea.hbm %s2434_s7, 64  ;;  %p2441_p6 = scmp.lt.s32.totalorder %s2434_s7, %s3265_s12 }
  0x28   : > { %p2436_p1 = scmp.ne.s32.totalorder %s2434_s7, %s2435_s6  ;;  %p2442_p7 = scmp.lt.s32.totalorder %s2440_s14, %s2435_s6 }
  0x2a   : > { %p2438_p3 = pnand %p2437_p2, %p2436_p1  ;;  %p2443_p11 = por %p2442_p7, %p2441_p6 }
  0x2c   : > { %p2439_p4 = pneg %p2438_p3 }
  0x2e   : > { %p2444_p12 = pnand %p2443_p11, %p2439_p4 }
  0x30   : > { %2447 = shalt.err (!%p2444_p12)
}
  0x31   : > { %s2682_s23 = smov 64   ;;  %s2683_s28 = smov 4  }
  0x32   : > { %2356 = dma.hbm_to_vmem [thread:$0]  (!%p2840_p0), %s321_s15, 1024, %s323_s16, %s311_s30, %s2682_s23, %s2682_s23, %s2683_s28  }
  0x33   : > { %s338_s18 = scalar_lea.hbm %s3242_s13, %s2679_s24  ;;  %s335_s29 = scalar_lea.vmem [#allocation16], %s2834_s21 }
  0x34   : > { %s340_s5 = sshll.u32 %s338_s18, 4  ;;  %s342_s7 = sshll.u32 %s335_s29, 4  ;;  %s341_s5 = int_to_ptr.hbm [resolvable:$true] %s340_s5  ;;  %s343_s7 = int_to_ptr.vmem [resolvable:$true] %s342_s7 }
  0x35   : > { %s333_s6 = scalar_lea.sflag [#allocation17], %s2834_s21  ;;  %s2463_s14 = sshra.s32 %s341_s5, 4  ;;  %s2464_s14 = int_to_ptr.hbm [resolvable:$true] %s2463_s14 }
  0x36   : > { %s2465_s26 = scalar_lea.hbm %s2464_s14, 1  ;;  %s2470_s16 = scalar_lea.hbm %s3242_s13, 4 }
  0x37   : > { %p2466_p13 = scmp.ne.s32.totalorder %s2464_s14, %s2465_s26  ;;  %p2471_p4 = scmp.lt.s32.totalorder %s2464_s14, %s3242_s13 }
  0x38   : > { %p2472_p6 = scmp.lt.s32.totalorder %s2470_s16, %s2465_s26 }
  0x39   : > { %p2468_p1 = pnand %p2466_p13, %p2437_p2 }
  0x3a   : > { %p2473_p7 = por %p2472_p6, %p2471_p4 }
  0x3b   : > { %p2469_p3 = pneg %p2468_p1 }
  0x3d   : > { %p2474_p11 = pnand %p2473_p7, %p2469_p3 }
  0x3f   : > { %2477 = shalt.err (!%p2474_p11)
}
  0x40   : > { %2359 = dma.hbm_to_vmem [thread:$0]  (!%p2840_p0), %s341_s5, 16, %s343_s7, %s333_s6  }
  0x41   : > { %351 = sbr.rel (%p2823_p10) target bundleno = 1646 (0x66e), region = 52  ;;  %s2883_s21 = sand.u32 (!%p2823_p10), 1, %s2671_s22  }
  0x42   : > { %s2030_s12 = sshll.u32 (!%p2823_p10), %s2883_s21, 6  ;;  %s354_s23 = scalar_lea.sflag (!%p2823_p10), [#allocation13], %s2883_s21 }
  0x43   : > { %s2887_s28 = scalar_lea.vmem (!%p2823_p10), [#allocation12], %s2030_s12 }
  0x46   : > { %2634 = dma.done.wait (%p2818_p8), %s354_s23, 1024  }
  0x47   : > { %2636 = vsyncadd (%p2818_p8), %s354_s23, 4294966272  ;;  %s364_s5 = scalar_lea.sflag [#allocation17], %s2883_s21  ;;  %s366_s17 = scalar_lea.vmem [#allocation16], %s2883_s21 }
  0x48   : > { %2638 = dma.done.wait (%p2818_p8), %s364_s5, 16  }
  0x49   : > { %2640 = vsyncadd (%p2818_p8), %s364_s5, 4294967280 }
  0x4a   : > { %2642 = dma.done.wait (%p159_p5), [#allocation15], 16  }
  0x4b   : > { %2644 = vsyncadd (%p159_p5), [#allocation15], 4294967280 }
  0x4c   : > { %377 = sfence }
  0x4d   : > { %p419_p10 = scmp.lt.s32.totalorder %s2794_s25, 3 }
  0x4f   : > { %s2905_s27 = scalar_select %p419_p10, %s2794_s25, 3 }
  0x50   : > { %436 = sbr.rel (%p2024_p9) target bundleno = 187 (0xbb), region = 68 }
  0x51   : > { %s421_s0 = scalar_lea.vmem %s3237_s8, %s2905_s27  ;;  %s424_s7 = scalar_lea.vmem %s3238_s9, %s2905_s27 }
  0x52   : > { %s2202_s6 = sshll.u32 %s2905_s27, 6  ;;  %s432_s15 = scalar_lea.vmem %s3240_s11, %s2905_s27 }
  0x53   : > { %s2923_s24 = scalar_lea.vmem %s3239_s10, %s2202_s6 }
  0x55   : > { %s3266_s5 = sld [smem:[#allocation57_spill]]  ;;  %s2684_s20 = smov [#allocation2]  }
  0x56   : > { %s446_s18 = sshll.u32 %s2684_s20, 4  ;;  %s447_s18 = int_to_ptr.vmem [resolvable:$true] %s446_s18 }
  0x5b   : > { %s444_s19 = sshll.u32 %s3266_s5, 4  ;;  %s445_s19 = int_to_ptr.hbm [resolvable:$true] %s444_s19 }
  0x5c   : > { %449 = dma.hbm_to_vmem [thread:$0]  %s445_s19, 2048, %s447_s18, [#allocation20] }
  0x5d   : > { %2645 = dma.done.wait [#allocation20], 2048 }
  0x5e   : > { %2646 = vsyncadd [#allocation20], 4294965248 }
  0x5f   : > { %s460_s26 = sshll.u32 %s3230_s1, 4  ;;  %s2685_s6 = smov [#allocation4]   ;;  %s461_s26 = int_to_ptr.hbm [resolvable:$true] %s460_s26 }
  0x60   : > { %s462_s16 = sshll.u32 %s2685_s6, 4  ;;  %s463_s16 = int_to_ptr.vmem [resolvable:$true] %s462_s16 }
  0x61   : > { %465 = dma.hbm_to_vmem [thread:$0]  %s461_s26, 1024, %s463_s16, [#allocation25] }
  0x62   : > { %2647 = dma.done.wait [#allocation25], 1024 }
  0x63   : > { %2648 = vsyncadd [#allocation25], 4294966272 }
  0x64   : > { %s477_s23 = sshll.u32 %s3231_s2, 4  ;;  %s2686_s5 = smov [#allocation5]   ;;  %s478_s23 = int_to_ptr.hbm [resolvable:$true] %s477_s23 }
  0x65   : > { %s479_s19 = sshll.u32 %s2686_s5, 4  ;;  %s480_s19 = int_to_ptr.vmem [resolvable:$true] %s479_s19 }
  0x66   : > { %482 = dma.hbm_to_vmem [thread:$0]  %s478_s23, 1024, %s480_s19, [#allocation28] }
  0x67   : > { %2649 = dma.done.wait [#allocation28], 1024 }
  0x68   : > { %2650 = vsyncadd [#allocation28], 4294966272 }
  0x69   : > { %v497_v0 = vld [vmem:[%s3232_s3] sm:$0xff]  ;;  %v499_v1 = vld [vmem:[%s3232_s3 + $0x8] sm:$0xff]  ;;  %v501_v2 = vld [vmem:[%s3232_s3 + $0x10] sm:$0xff] }
  0x6a   : > { %498 = vst [vmem:[#allocation6] sm:$0xff] %v497_v0  ;;  %v503_v3 = vld [vmem:[%s3232_s3 + $0x18] sm:$0xff]  ;;  %v505_v4 = vld [vmem:[%s3232_s3 + $0x20] sm:$0xff]  ;;  %v507_v5 = vld [vmem:[%s3232_s3 + $0x28] sm:$0xff] }
  0x6b   : > { %500 = vst [vmem:[#allocation6 + $0x18] sm:$0xff] %v499_v1  ;;  %v509_v6 = vld [vmem:[%s3232_s3 + $0x30] sm:$0xff]  ;;  %v511_v7 = vld [vmem:[%s3232_s3 + $0x38] sm:$0xff]  ;;  %v513_v8 = vld [vmem:[%s3232_s3 + $0x40] sm:$0xff] }
  0x6c   : > { %502 = vst [vmem:[#allocation6 + $0x50] sm:$0xff] %v501_v2  ;;  %v515_v9 = vld [vmem:[%s3232_s3 + $0x48] sm:$0xff]  ;;  %v517_v10 = vld [vmem:[%s3232_s3 + $0x50] sm:$0xff]  ;;  %v519_v11 = vld [vmem:[%s3232_s3 + $0x58] sm:$0xff] }
  0x6d   : > { %504 = vst [vmem:[#allocation6 + $0x60] sm:$0xff] %v503_v3  ;;  %v521_v12 = vld [vmem:[%s3232_s3 + $0x60] sm:$0xff]  ;;  %v523_v13 = vld [vmem:[%s3232_s3 + $0x68] sm:$0xff]  ;;  %v525_v14 = vld [vmem:[%s3232_s3 + $0x70] sm:$0xff] }
  0x6e   : > { %506 = vst [vmem:[#allocation6 + $0x68] sm:$0xff] %v505_v4  ;;  %v527_v15 = vld [vmem:[%s3232_s3 + $0x78] sm:$0xff] }
  0x6f   : > { %508 = vst [vmem:[#allocation6 + $0x20] sm:$0xff] %v507_v5 }
  0x70   : > { %510 = vst [vmem:[#allocation6 + $0x70] sm:$0xff] %v509_v6 }
  0x71   : > { %512 = vst [vmem:[#allocation6 + $0x10] sm:$0xff] %v511_v7 }
  0x72   : > { %514 = vst [vmem:[#allocation6 + $0x28] sm:$0xff] %v513_v8 }
  0x73   : > { %516 = vst [vmem:[#allocation6 + $0x40] sm:$0xff] %v515_v9 }
  0x74   : > { %518 = vst [vmem:[#allocation6 + $0x38] sm:$0xff] %v517_v10 }
  0x75   : > { %520 = vst [vmem:[#allocation6 + $0x8] sm:$0xff] %v519_v11 }
  0x76   : > { %522 = vst [vmem:[#allocation6 + $0x58] sm:$0xff] %v521_v12 }
  0x77   : > { %524 = vst [vmem:[#allocation6 + $0x48] sm:$0xff] %v523_v13 }
  0x78   : > { %526 = vst [vmem:[#allocation6 + $0x78] sm:$0xff] %v525_v14 }
  0x79   : > { %528 = vst [vmem:[#allocation6 + $0x30] sm:$0xff] %v527_v15 }
  0x7a   : > { %534 = vsyncadd [#allocation31], 2048 }
  0x7b   : > { %2651 = dma.done.wait [#allocation31], 2048 }
  0x7c   : > { %2652 = vsyncadd [#allocation31], 4294965248 }
  0x7d   : > { %v548_v16 = vld [vmem:[%s3233_s4] sm:$0xff]  ;;  %v550_v17 = vld [vmem:[%s3233_s4 + $0x8] sm:$0xff]  ;;  %v552_v18 = vld [vmem:[%s3233_s4 + $0x10] sm:$0xff] }
  0x7e   : > { %549 = vst [vmem:[#allocation7 + $0x30] sm:$0xff] %v548_v16  ;;  %v554_v19 = vld [vmem:[%s3233_s4 + $0x18] sm:$0xff]  ;;  %v556_v20 = vld [vmem:[%s3233_s4 + $0x20] sm:$0xff]  ;;  %v558_v21 = vld [vmem:[%s3233_s4 + $0x28] sm:$0xff] }
  0x7f   : > { %551 = vst [vmem:[#allocation7] sm:$0xff] %v550_v17  ;;  %v560_v22 = vld [vmem:[%s3233_s4 + $0x30] sm:$0xff]  ;;  %v562_v23 = vld [vmem:[%s3233_s4 + $0x38] sm:$0xff]  ;;  %v564_v24 = vld [vmem:[%s3233_s4 + $0x40] sm:$0xff] }
  0x80   : > { %553 = vst [vmem:[#allocation7 + $0x40] sm:$0xff] %v552_v18  ;;  %v566_v25 = vld [vmem:[%s3233_s4 + $0x48] sm:$0xff]  ;;  %v568_v26 = vld [vmem:[%s3233_s4 + $0x50] sm:$0xff]  ;;  %v570_v27 = vld [vmem:[%s3233_s4 + $0x58] sm:$0xff] }
  0x81   : > { %555 = vst [vmem:[#allocation7 + $0x58] sm:$0xff] %v554_v19  ;;  %v572_v28 = vld [vmem:[%s3233_s4 + $0x60] sm:$0xff]  ;;  %v574_v29 = vld [vmem:[%s3233_s4 + $0x68] sm:$0xff]  ;;  %v576_v30 = vld [vmem:[%s3233_s4 + $0x70] sm:$0xff] }
  0x82   : > { %557 = vst [vmem:[#allocation7 + $0x8] sm:$0xff] %v556_v20  ;;  %v578_v31 = vld [vmem:[%s3233_s4 + $0x78] sm:$0xff] }
  0x83   : > { %559 = vst [vmem:[#allocation7 + $0x28] sm:$0xff] %v558_v21 }
  0x84   : > { %561 = vst [vmem:[#allocation7 + $0x38] sm:$0xff] %v560_v22 }
  0x85   : > { %563 = vst [vmem:[#allocation7 + $0x20] sm:$0xff] %v562_v23 }
  0x86   : > { %565 = vst [vmem:[#allocation7 + $0x78] sm:$0xff] %v564_v24 }
  0x87   : > { %567 = vst [vmem:[#allocation7 + $0x50] sm:$0xff] %v566_v25 }
  0x88   : > { %569 = vst [vmem:[#allocation7 + $0x18] sm:$0xff] %v568_v26 }
  0x89   : > { %571 = vst [vmem:[#allocation7 + $0x70] sm:$0xff] %v570_v27 }
  0x8a   : > { %573 = vst [vmem:[#allocation7 + $0x60] sm:$0xff] %v572_v28 }
  0x8b   : > { %575 = vst [vmem:[#allocation7 + $0x10] sm:$0xff] %v574_v29 }
  0x8c   : > { %577 = vst [vmem:[#allocation7 + $0x68] sm:$0xff] %v576_v30 }
  0x8d   : > { %579 = vst [vmem:[#allocation7 + $0x48] sm:$0xff] %v578_v31 }
  0x8e   : > { %585 = vsyncadd [#allocation33], 2048 }
  0x8f   : > { %2653 = dma.done.wait [#allocation33], 2048 }
  0x90   : > { %2654 = vsyncadd [#allocation33], 4294965248 }
  0x91   : > { %s3267_s16 = sld [smem:[#allocation58_spill]] }
  0x97   : > { %v615_v32 = vld [vmem:[%s3267_s16] sm:$0xff] }
  0x98   : > { %616 = vst [vmem:[#allocation8] sm:$0xff] %v615_v32 }
  0x99   : > { %622 = vsyncadd [#allocation35], 128 }
  0x9a   : > { %2655 = dma.done.wait [#allocation35], 128 }
  0x9b   : > { %2656 = vsyncadd [#allocation35], 4294967168 }
  0x9c   : > { %s3268_s23 = sld [smem:[#allocation59_spill]] }
  0xa2   : > { %v652_v33 = vld [vmem:[%s3268_s23] sm:$0xff] }
  0xa3   : > { %653 = vst [vmem:[#allocation9] sm:$0xff] %v652_v33 }
  0xa4   : > { %659 = vsyncadd [#allocation37], 128 }
  0xa5   : > { %2657 = dma.done.wait [#allocation37], 128 }
  0xa6   : > { %2658 = vsyncadd [#allocation37], 4294967168 }
  0xa7   : > { %s3269_s20 = sld [smem:[#allocation60_spill]]  ;;  %s2687_s29 = smov [#allocation10]  }
  0xa8   : > { %s672_s14 = sshll.u32 %s2687_s29, 4  ;;  %s673_s14 = int_to_ptr.vmem [resolvable:$true] %s672_s14 }
  0xad   : > { %s670_s18 = sshll.u32 %s3269_s20, 4  ;;  %s671_s18 = int_to_ptr.hbm [resolvable:$true] %s670_s18 }
  0xae   : > { %675 = dma.hbm_to_vmem [thread:$0]  %s671_s18, 8192, %s673_s14, [#allocation39] }
  0xaf   : > { %2659 = dma.done.wait [#allocation39], 8192 }
  0xb0   : > { %2660 = vsyncadd [#allocation39], 4294959104  ;;  %v679_v34 = vld [vmem:[#allocation2] sm:$0xff]  ;;  %v680_v35 = vld [vmem:[#allocation2 + $0x8] sm:$0xff] }
  0xb1   : > { %v681_v36 = vld [vmem:[#allocation2 + $0x10] sm:$0xff]  ;;  %v2246_v37 = vpack.c.bf16 %v680_v35, %v679_v34  ;;  %v682_v38 = vld [vmem:[#allocation2 + $0x18] sm:$0xff]  ;;  %v683_v39 = vld [vmem:[#allocation2 + $0x20] sm:$0xff] }
  0xb2   : > { %v684_v40 = vld [vmem:[#allocation2 + $0x28] sm:$0xff]  ;;  %v2251_v41 = vpack.c.bf16 %v682_v38, %v681_v36  ;;  %v685_v43 = vld [vmem:[#allocation2 + $0x30] sm:$0xff]  ;;  %v686_v44 = vld [vmem:[#allocation2 + $0x38] sm:$0xff] }
  0xb3   : > { %v2256_v42 = vpack.c.bf16 %v684_v40, %v683_v39  ;;  %v687_v45 = vld [vmem:[#allocation2 + $0x40] sm:$0xff]  ;;  %2247 = vst [vmem:[#allocation3 + $0x30] sm:$0xff] %v2246_v37   ;;  %v2261_v46 = vpack.c.bf16 %v686_v44, %v685_v43  ;;  %v688_v47 = vld [vmem:[#allocation2 + $0x48] sm:$0xff]  ;;  %v689_v48 = vld [vmem:[#allocation2 + $0x50] sm:$0xff] }
  0xb4   : > { %v690_v49 = vld [vmem:[#allocation2 + $0x58] sm:$0xff]  ;;  %2323 = vst [vmem:[#allocation3] sm:$0xff] %v2251_v41   ;;  %v2266_v50 = vpack.c.bf16 %v688_v47, %v687_v45  ;;  %v691_v52 = vld [vmem:[#allocation2 + $0x60] sm:$0xff]  ;;  %v692_v53 = vld [vmem:[#allocation2 + $0x68] sm:$0xff] }
  0xb5   : > { %v2271_v51 = vpack.c.bf16 %v690_v49, %v689_v48  ;;  %v693_v54 = vld [vmem:[#allocation2 + $0x70] sm:$0xff]  ;;  %2324 = vst [vmem:[#allocation3 + $0x18] sm:$0xff] %v2256_v42   ;;  %v2276_v55 = vpack.c.bf16 %v692_v53, %v691_v52  ;;  %v694_v56 = vld [vmem:[#allocation2 + $0x78] sm:$0xff] }
  0xb6   : > { %2325 = vst [vmem:[#allocation3 + $0x10] sm:$0xff] %v2261_v46   ;;  %v2281_v57 = vpack.c.bf16 %v694_v56, %v693_v54 }
  0xb7   : > { %2326 = vst [vmem:[#allocation3 + $0x8] sm:$0xff] %v2266_v50  }
  0xb8   : > { %2327 = vst [vmem:[#allocation3 + $0x20] sm:$0xff] %v2271_v51  }
  0xb9   : > { %2328 = vst [vmem:[#allocation3 + $0x28] sm:$0xff] %v2276_v55  }
  0xba   : > { %2329 = vst [vmem:[#allocation3 + $0x38] sm:$0xff] %v2281_v57  }
  0xbb PF: > { %v773_v59 = vld [vmem:[#allocation7 + $0x68] sm:$0xff]  ;;  %v2688_v60 = vmov 0   ;;  %v771_v62 = vld [vmem:[#allocation7 + $0x60] sm:$0xff]  ;;  %v769_v63 = vld [vmem:[#allocation7 + $0x18] sm:$0xff]  ;;  %s2195_s21 = sshll.u32 %s2794_s25, 3  ;;  %p2196_p5 = scmp.ne.s32.totalorder %s2794_s25, 3 }
  0xbc   : > { %2406 = vset.pattern.permute.xlu0 %v2688_v60  ;;  %2408 = vset.pattern.permute.xlu2 %v2688_v60  ;;  %v774_v1 = vld [vmem:[#allocation7 + $0x48] sm:$0xff]  ;;  %v772_v2 = vld [vmem:[#allocation7 + $0x10] sm:$0xff]  ;;  %v767_v6 = vld [vmem:[#allocation7 + $0x78] sm:$0xff] }
  0xbd   : > { %848 = vperm.xlu0 %2406, %v773_v59   ;;  %2407 = vset.pattern.permute.xlu1 %v2688_v60  ;;  %v770_v4 = vld [vmem:[#allocation7 + $0x70] sm:$0xff]  ;;  %v2205_v8 = vld [vmem:[#allocation3 + $0x18] sm:$0xff]  ;;  %v2204_v10 = vld [vmem:[#allocation3] sm:$0xff] }
  0xbe   : > { %838 = vperm.xlu1 %2407, %v771_v62   ;;  %828 = vperm.xlu2 %2408, %v769_v63   ;;  %v2207_v3 = vld [vmem:[#allocation3 + $0x8] sm:$0xff]  ;;  %v2206_v5 = vld [vmem:[#allocation3 + $0x10] sm:$0xff]  ;;  %v765_v9 = vld [vmem:[#allocation7 + $0x38] sm:$0xff] }
  0xbf   : > { %v2208_v0 = vld [vmem:[#allocation3 + $0x20] sm:$0xff]  ;;  %v768_v7 = vld [vmem:[#allocation7 + $0x50] sm:$0xff]  ;;  %v763_v12 = vld [vmem:[#allocation7 + $0x8] sm:$0xff] }
  0xc0   : > { %v2209_v61 = vld [vmem:[#allocation3 + $0x28] sm:$0xff]  ;;  %v766_v11 = vld [vmem:[#allocation7 + $0x20] sm:$0xff]  ;;  %v2203_v13 = vld [vmem:[#allocation3 + $0x30] sm:$0xff] }
  0xc1   : > { %v2210_v58 = vld [vmem:[#allocation3 + $0x38] sm:$0xff]  ;;  %v764_v14 = vld [vmem:[#allocation7 + $0x28] sm:$0xff]  ;;  %v2211_v15 = vld [vmem:[#allocation4] sm:$0xff] }
  0xc2   : > { %1007 = vmatpush.bf16.msra.mxu0 %v2210_v58  ;;  %v761_v16 = vld [vmem:[#allocation7 + $0x40] sm:$0xff]  ;;  %v762_v17 = vld [vmem:[#allocation7 + $0x58] sm:$0xff]  ;;  %v759_v18 = vld [vmem:[#allocation7 + $0x30] sm:$0xff] }
  0xc3   : > { %v760_v19 = vld [vmem:[#allocation7] sm:$0xff]  ;;  %v2212_v20 = vld [vmem:[#allocation4 + $0x8] sm:$0xff]  ;;  %v2213_v21 = vld [vmem:[#allocation4 + $0x10] sm:$0xff] }
  0xc4   : > { %v1193_v22 = vld [vmem:[#allocation6] sm:$0xff]  ;;  %v2214_v23 = vld [vmem:[#allocation4 + $0x18] sm:$0xff]  ;;  %v1195_v24 = vld [vmem:[#allocation6 + $0x50] sm:$0xff] }
  0xc5   : > { %853 = vperm.xlu0 %2406, %v774_v1   ;;  %v1196_v25 = vld [vmem:[#allocation6 + $0x60] sm:$0xff]  ;;  %v1199_v27 = vld [vmem:[#allocation6 + $0x70] sm:$0xff]  ;;  %v1201_v29 = vld [vmem:[#allocation6 + $0x28] sm:$0xff] }
  0xc6   : > { %1008 = vmatpush.bf16.msra.mxu0 %v2209_v61  ;;  %843 = vperm.xlu1 %2407, %v772_v2   ;;  %v1198_v26 = vld [vmem:[#allocation6 + $0x20] sm:$0xff]  ;;  %v1194_v31 = vld [vmem:[#allocation6 + $0x18] sm:$0xff]  ;;  %v1204_v32 = vld [vmem:[#allocation6 + $0x8] sm:$0xff] }
  0xc7   : > { %833 = vperm.xlu2 %2408, %v770_v4   ;;  %v2215_v28 = vld [vmem:[#allocation4 + $0x20] sm:$0xff]  ;;  %v1205_v33 = vld [vmem:[#allocation6 + $0x58] sm:$0xff]  ;;  %v2216_v34 = vld [vmem:[#allocation4 + $0x28] sm:$0xff] }
  0xc8   : > { %v1202_v30 = vld [vmem:[#allocation6 + $0x40] sm:$0xff]  ;;  %v1207_v35 = vld [vmem:[#allocation6 + $0x78] sm:$0xff]  ;;  %v1197_v36 = vld [vmem:[#allocation6 + $0x68] sm:$0xff] }
  0xc9   : > { %v1208_v37 = vld [vmem:[#allocation6 + $0x30] sm:$0xff]  ;;  %v1203_v44 = vld [vmem:[#allocation6 + $0x38] sm:$0xff]  ;;  %v1206_v48 = vld [vmem:[#allocation6 + $0x48] sm:$0xff] }
  0xca   : > { %1009 = vmatpush.bf16.msra.mxu0 %v2208_v0  ;;  %v1200_v40 = vld [vmem:[#allocation6 + $0x10] sm:$0xff]  ;;  %v2218_v50 = vld [vmem:[#allocation4 + $0x38] sm:$0xff]  ;;  %v1691_v53 = vld [vmem:[#allocation9] sm:$0xff] }
  0xcb   : > { %v2217_v43 = vld [vmem:[#allocation4 + $0x30] sm:$0xff]  ;;  %v3062_v56 = vld [vmem:[%s421_s0] ss:$0 sm:$0xff]  ;;  %s1305_s0 = sld [smem:[#allocation18 + %s2794_s25]] }
  0xcc   : > { %v3070_v60 = vld [vmem:[%s424_s7] ss:$0 sm:$0xff] }
  0xcd   : > { %818 = vperm.xlu0 %2406, %v767_v6  }
  0xce   : > { %1010 = vmatpush.bf16.msra.mxu0 %v2207_v3  ;;  %823 = vperm.xlu1 %2407, %v768_v7  }
  0xcf   : > { %808 = vperm.xlu2 %2408, %v765_v9  }
  0xd1   : > { %s1306_s7 = sadd.f32 1.0, %s1305_s0 }
  0xd2   : > { %1011 = vmatpush.bf16.msra.mxu0 %v2206_v5 }
  0xd5   : > { %813 = vperm.xlu0 %2406, %v766_v11  }
  0xd6   : > { %1012 = vmatpush.bf16.msra.mxu0 %v2205_v8  ;;  %798 = vperm.xlu1 %2407, %v763_v12  }
  0xd7   : > { %803 = vperm.xlu2 %2408, %v764_v14  }
  0xda   : > { %1013 = vmatpush.bf16.msra.mxu0 %v2204_v10 }
  0xdd   : > { %788 = vperm.xlu0 %2406, %v761_v16  }
  0xde   : > { %1014 = vmatpush.bf16.msra.mxu0 %v2203_v13  ;;  %793 = vperm.xlu1 %2407, %v762_v17  }
  0xdf   : > { %778 = vperm.xlu2 %2408, %v759_v18  }
  0xe1   : > { %1015 = vmatmul.bf16.vlgmr.msra.gmra.mxu0 %v2211_v15 }
  0xe5   : > { %783 = vperm.xlu0 %2406, %v760_v19  }
  0xe6   : > { %1211 = vperm.xlu1 %2407, %v1193_v22  }
  0xe7   : > { %1216 = vperm.xlu2 %2408, %v1194_v31  }
  0xed   : > { %1221 = vperm.xlu0 %2406, %v1195_v24  }
  0xee   : > { %1226 = vperm.xlu1 %2407, %v1196_v25  }
  0xef   : > { %1231 = vperm.xlu2 %2408, %v1197_v36  }
  0xf1   : > { %1020 = vmatmul.bf16.gmra.mxu0 %v2212_v20 }
  0xf5   : > { %1236 = vperm.xlu0 %2406, %v1198_v26  }
  0xf6   : > { %1241 = vperm.xlu1 %2407, %v1199_v27  }
  0xf7   : > { %1246 = vperm.xlu2 %2408, %v1200_v40  }
  0xfd   : > { %1251 = vperm.xlu0 %2406, %v1201_v29  }
  0xfe   : > { %1256 = vperm.xlu1 %2407, %v1202_v30  }
  0xff   : > { %1261 = vperm.xlu2 %2408, %v1203_v44  }
 0x101   : > { %1025 = vmatmul.bf16.gmra.mxu0 %v2213_v21 }
 0x105   : > { %1266 = vperm.xlu0 %2406, %v1204_v32  }
 0x106   : > { %1271 = vperm.xlu1 %2407, %v1205_v33  }
 0x107   : > { %1276 = vperm.xlu2 %2408, %v1206_v48  }
 0x10d   : > { %1281 = vperm.xlu0 %2406, %v1207_v35  }
 0x10e   : > { %1286 = vperm.xlu1 %2407, %v1208_v37  }
 0x10f   : > { %1694 = vperm.xlu2 %2408, %v1691_v53  }
 0x111   : > { %1030 = vmatmul.bf16.gmra.mxu0 %v2214_v23 }
 0x118   : > { %v3041_v38 = vpop.permute.xlu2 %828 }
 0x121   : > { %1035 = vmatmul.bf16.gmra.mxu0 %v2215_v28  ;;  %v3047_v42 = vpop.permute.xlu2 %833 }
 0x129   : > { %v809_v47 = vpop.permute.xlu2 %808 }
 0x12a   : > { %v865_v31 = vmul.f32 %v3062_v56, %v809_v47 }
 0x12f   : > { %v3043_v39 = vpop.permute.xlu0 %848 }
 0x130   : > { %v3051_v46 = vpop.permute.xlu1 %838 }
 0x131   : > { %1040 = vmatmul.bf16.gmra.mxu0 %v2216_v34  ;;  %v804_v52 = vpop.permute.xlu2 %803  ;;  %v885_v34 = vadd.f32 %v3070_v60, %v865_v31  ;;  %v2231_v31 = vld [vmem:[%s2923_s24 + $0x20] sm:$0xff] }
 0x132   : > { %v864_v22 = vmul.f32 %v3062_v56, %v804_v52 }
 0x134   : > { %v884_v24 = vadd.f32 %v3070_v60, %v864_v22 }
 0x137   : > { %v3045_v41 = vpop.permute.xlu0 %853 }
 0x138   : > { %v3053_v51 = vpop.permute.xlu1 %843 }
 0x139   : > { %v779_v57 = vpop.permute.xlu2 %778 }
 0x13a   : > { %v859_v59 = vmul.f32 %v3062_v56, %v779_v57 }
 0x13c   : > { %v879_v63 = vadd.f32 %v3070_v60, %v859_v59  ;;  %v872_v59 = vmul.f32 %v3062_v56, %v3053_v51 }
 0x13f   : > { %v3049_v45 = vpop.permute.xlu0 %818 }
 0x140   : > { %v3055_v55 = vpop.permute.xlu1 %823 }
 0x141   : > { %1045 = vmatmul.bf16.gmra.mxu0 %v2217_v43 }
 0x147   : > { %v814_v49 = vpop.permute.xlu0 %813 }
 0x148   : > { %v799_v0 = vpop.permute.xlu1 %798  ;;  %v866_v33 = vmul.f32 %v3062_v56, %v814_v49  ;;  %v873_v49 = vmul.f32 %v3062_v56, %v3043_v39 }
 0x149   : > { %v863_v20 = vmul.f32 %v3062_v56, %v799_v0  ;;  %v892_v0 = vadd.f32 %v3070_v60, %v872_v59 }
 0x14a   : > { %v886_v35 = vadd.f32 %v3070_v60, %v866_v33  ;;  %v2225_v33 = vld [vmem:[#allocation5 + $0x30] sm:$0xff] }
 0x14b   : > { %v883_v23 = vadd.f32 %v3070_v60, %v863_v20 }
 0x14f   : > { %v789_v54 = vpop.permute.xlu0 %788 }
 0x150   : > { %v794_v8 = vpop.permute.xlu1 %793  ;;  %v861_v9 = vmul.f32 %v3062_v56, %v789_v54 }
 0x151   : > { %1050 = vmatmul.bf16.gmra.mxu0 %v2218_v50  ;;  %v862_v11 = vmul.f32 %v3062_v56, %v794_v8 }
 0x152   : > { %v881_v12 = vadd.f32 %v3070_v60, %v861_v9 }
 0x153   : > { %v882_v13 = vadd.f32 %v3070_v60, %v862_v11 }
 0x157   : > { %v784_v58 = vpop.permute.xlu0 %783 }
 0x158   : > { %v860_v62 = vmul.f32 %v3062_v56, %v784_v58 }
 0x15a   : > { %v880_v1 = vadd.f32 %v3070_v60, %v860_v62  ;;  %v871_v62 = vmul.f32 %v3062_v56, %v3051_v46 }
 0x15c   : > { %v891_v39 = vadd.f32 %v3070_v60, %v871_v62 }
 0x15e   : > { %v1016_v61 = vpop.f32.mrf.mxu0 }
 0x15f   : > { %v1017_v2 = vadd.f32 %v1016_v61, %v879_v63  ;;  %v874_v61 = vmul.f32 %v3062_v56, %v3045_v41  ;;  %v870_v63 = vmul.f32 %v3062_v56, %v3047_v42  ;;  %v868_v41 = vmul.f32 %v3062_v56, %v3055_v55 }
 0x161   : > { %v1056_v5 = vmax.f32 %v1017_v2, 0.0  ;;  %v869_v2 = vmul.f32 %v3062_v56, %v3041_v38  ;;  %v894_v51 = vadd.f32 %v3070_v60, %v874_v61  ;;  %v890_v46 = vadd.f32 %v3070_v60, %v870_v63  ;;  %v729_v63 = vld [vmem:[#allocation2 + $0x10] sm:$0xff] }
 0x162   : > { %v888_v11 = vadd.f32 %v3070_v60, %v868_v41 }
 0x163   : > { %v889_v8 = vadd.f32 %v3070_v60, %v869_v2 }
 0x166   : > { %v1018_v3 = vpop.f32.mrf.mxu0 }
 0x167   : > { %v1019_v4 = vadd.f32 %v1018_v3, %v880_v1  ;;  %v893_v1 = vadd.f32 %v3070_v60, %v873_v49 }
 0x169   : > { %v1057_v6 = vmax.f32 %v1019_v4, 0.0 }
 0x16b   : > { %v3075_v7 = vpack.c.bf16 %v1057_v6, %v1056_v5  ;;  %v867_v6 = vmul.f32 %v3062_v56, %v3049_v45 }
 0x16e   : > { %v1021_v10 = vpop.f32.mrf.mxu0 }
 0x16f   : > { %v1022_v14 = vadd.f32 %v1021_v10, %v881_v12 }
 0x171   : > { %v1058_v17 = vmax.f32 %v1022_v14, 0.0 }
 0x176   : > { %v1023_v15 = vpop.f32.mrf.mxu0 }
 0x177   : > { %v1024_v16 = vadd.f32 %v1023_v15, %v882_v13  ;;  %v887_v15 = vadd.f32 %v3070_v60, %v867_v6  ;;  %v2219_v60 = vld [vmem:[#allocation5] sm:$0xff] }
 0x179   : > { %v1059_v18 = vmax.f32 %v1024_v16, 0.0 }
 0x17b   : > { %v3081_v19 = vpack.c.bf16 %v1059_v18, %v1058_v17 }
 0x17e   : > { %v1026_v21 = vpop.f32.mrf.mxu0 }
 0x17f   : > { %v1027_v25 = vadd.f32 %v1026_v21, %v883_v23 }
 0x181   : > { %v1060_v28 = vmax.f32 %v1027_v25, 0.0  ;;  %v2220_v25 = vld [vmem:[#allocation5 + $0x8] sm:$0xff] }
 0x186   : > { %v1028_v26 = vpop.f32.mrf.mxu0 }
 0x187   : > { %v1029_v27 = vadd.f32 %v1028_v26, %v884_v24  ;;  %v2221_v26 = vld [vmem:[#allocation5 + $0x10] sm:$0xff] }
 0x189   : > { %v1061_v29 = vmax.f32 %v1029_v27, 0.0  ;;  %v2222_v27 = vld [vmem:[#allocation5 + $0x18] sm:$0xff] }
 0x18b   : > { %v1074_v30 = vpack.c.bf16 %v1061_v29, %v1060_v28  ;;  %v2223_v28 = vld [vmem:[#allocation5 + $0x20] sm:$0xff]  ;;  %v2234_v29 = vld [vmem:[%s2923_s24 + $0x38] sm:$0xff] }
 0x18c   : > { %1416 = vmatpush.bf16.msra.mxu2 %v2234_v29 }
 0x18e   : > { %v1031_v32 = vpop.f32.mrf.mxu0 }
 0x18f   : > { %v1032_v36 = vadd.f32 %v1031_v32, %v885_v34  ;;  %v2230_v32 = vld [vmem:[%s2923_s24 + $0x18] sm:$0xff]  ;;  %v2229_v34 = vld [vmem:[%s2923_s24 + $0x10] sm:$0xff] }
 0x191   : > { %v1062_v43 = vmax.f32 %v1032_v36, 0.0  ;;  %v2227_v36 = vld [vmem:[%s2923_s24] sm:$0xff] }
 0x196   : > { %v1033_v37 = vpop.f32.mrf.mxu0 }
 0x197   : > { %v1034_v40 = vadd.f32 %v1033_v37, %v886_v35  ;;  %v2228_v35 = vld [vmem:[%s2923_s24 + $0x8] sm:$0xff]  ;;  %v2226_v37 = vld [vmem:[#allocation5 + $0x38] sm:$0xff] }
 0x199   : > { %v1063_v44 = vmax.f32 %v1034_v40, 0.0 }
 0x19b   : > { %v1075_v48 = vpack.c.bf16 %v1063_v44, %v1062_v43  ;;  %v727_v43 = vld [vmem:[#allocation2] sm:$0xff]  ;;  %v3126_v44 = vstv %s1306_s7 }
 0x19e   : > { %v1036_v50 = vpop.f32.mrf.mxu0 }
 0x19f   : > { %v1037_v21 = vadd.f32 %v1036_v50, %v887_v15  ;;  %v1212_v50 = vpop.permute.xlu1 %1211 }
 0x1a1   : > { %v1064_v23 = vmax.f32 %v1037_v21, 0.0  ;;  %v734_v21 = vld [vmem:[#allocation2 + $0x38] sm:$0xff] }
 0x1a6   : > { %v1038_v52 = vpop.f32.mrf.mxu0 }
 0x1a7   : > { %v1039_v17 = vadd.f32 %v1038_v52, %v888_v11 }
 0x1a9   : > { %v1065_v56 = vmax.f32 %v1039_v17, 0.0 }
 0x1ab   : > { %v1076_v24 = vpack.c.bf16 %v1065_v56, %v1064_v23  ;;  %v1315_v23 = vmul.f32 %v3126_v44, %v734_v21 }
 0x1ae   : > { %v1041_v53 = vpop.f32.mrf.mxu0 }
 0x1af   : > { %v1042_v55 = vadd.f32 %v1041_v53, %v889_v8  ;;  %v1308_v53 = vmul.f32 %v3126_v44, %v727_v43  ;;  %v731_v8 = vld [vmem:[#allocation2 + $0x20] sm:$0xff] }
 0x1b0   : > { %v1312_v11 = vmul.f32 %v3126_v44, %v731_v8 }
 0x1b1   : > { %v1066_v45 = vmax.f32 %v1042_v55, 0.0 }
 0x1b6   : > { %v1043_v54 = vpop.f32.mrf.mxu0 }
 0x1b7   : > { %v1044_v12 = vadd.f32 %v1043_v54, %v890_v46 }
 0x1b9   : > { %v1067_v18 = vmax.f32 %v1044_v12, 0.0 }
 0x1bb   : > { %v1077_v22 = vpack.c.bf16 %v1067_v18, %v1066_v45 }
 0x1be   : > { %v1046_v57 = vpop.f32.mrf.mxu0 }
 0x1bf   : > { %v1047_v9 = vadd.f32 %v1046_v57, %v891_v39  ;;  %v1217_v57 = vpop.permute.xlu2 %1216  ;;  %v1310_v39 = vmul.f32 %v3126_v44, %v729_v63 }
 0x1c1   : > { %v1068_v16 = vmax.f32 %v1047_v9, 0.0  ;;  %v732_v9 = vld [vmem:[#allocation2 + $0x28] sm:$0xff] }
 0x1c2   : > { %v1313_v12 = vmul.f32 %v3126_v44, %v732_v9  ;;  %v2239_v9 = vld [vmem:[%s2887_s28 + $0x20] sm:$0xff] }
 0x1c6   : > { %v1048_v58 = vpop.f32.mrf.mxu0 }
 0x1c7   : > { %v1049_v5 = vadd.f32 %v1048_v58, %v892_v0  ;;  %v730_v0 = vld [vmem:[#allocation2 + $0x18] sm:$0xff] }
 0x1c9   : > { %v1069_v13 = vmax.f32 %v1049_v5, 0.0 }
 0x1cb   : > { %v1078_v20 = vpack.c.bf16 %v1069_v13, %v1068_v16 }
 0x1ce   : > { %v1051_v47 = vpop.f32.mrf.mxu0 }
 0x1cf   : > { %v1052_v3 = vadd.f32 %v1051_v47, %v893_v1  ;;  %v1222_v1 = vpop.permute.xlu0 %1221 }
 0x1d1   : > { %v1070_v38 = vmax.f32 %v1052_v3, 0.0  ;;  %v1311_v3 = vmul.f32 %v3126_v44, %v730_v0  ;;  %v2242_v0 = vld [vmem:[%s2887_s28 + $0x38] sm:$0xff] }
 0x1d2   : > { %1557 = vmatpush.bf16.msra.mxu3 %v2242_v0 }
 0x1d6   : > { %v1053_v4 = vpop.f32.mrf.mxu0 }
 0x1d7   : > { %v1054_v42 = vadd.f32 %v1053_v4, %v894_v51  ;;  %v1227_v51 = vpop.permute.xlu1 %1226  ;;  %v1237_v13 = vpop.permute.xlu0 %1236 }
 0x1d9   : > { %v1071_v10 = vmax.f32 %v1054_v42, 0.0 }
 0x1db   : > { %v1079_v14 = vpack.c.bf16 %v1071_v10, %v1070_v38  ;;  %v1232_v38 = vpop.permute.xlu2 %1231 }
 0x1dd   : > { %1144 = vmatpush.bf16.msra.mxu1 %v1079_v14 }
 0x1df   : > { %v1242_v45 = vpop.permute.xlu1 %1241 }
 0x1e1   : > { %1145 = vmatpush.bf16.msra.mxu1 %v1078_v20  ;;  %v733_v20 = vld [vmem:[#allocation2 + $0x30] sm:$0xff] }
 0x1e5   : > { %1146 = vmatpush.bf16.msra.mxu1 %v1077_v22  ;;  %v1314_v22 = vmul.f32 %v3126_v44, %v733_v20 }
 0x1e9   : > { %1147 = vmatpush.bf16.msra.mxu1 %v1076_v24  ;;  %v1247_v24 = vpop.permute.xlu2 %1246 }
 0x1ed   : > { %1148 = vmatpush.bf16.msra.mxu1 %v1075_v48  ;;  %v728_v48 = vld [vmem:[#allocation2 + $0x8] sm:$0xff] }
 0x1ee   : > { %v1309_v54 = vmul.f32 %v3126_v44, %v728_v48 }
 0x1f1   : > { %1149 = vmatpush.bf16.msra.mxu1 %v1074_v30  ;;  %v2233_v30 = vld [vmem:[%s2923_s24 + $0x30] sm:$0xff] }
 0x1f2   : > { %1417 = vmatpush.bf16.msra.mxu2 %v2233_v30  ;;  %v736_v30 = vld [vmem:[#allocation2 + $0x48] sm:$0xff] }
 0x1f5   : > { %1150 = vmatpush.bf16.msra.mxu1 %v3081_v19  ;;  %v2224_v19 = vld [vmem:[#allocation5 + $0x28] sm:$0xff] }
 0x1f9   : > { %1151 = vmatpush.bf16.msra.mxu1 %v3075_v7  ;;  %v2232_v7 = vld [vmem:[%s2923_s24 + $0x28] sm:$0xff] }
 0x1fa   : > { %1418 = vmatpush.bf16.msra.mxu2 %v2232_v7  ;;  %v1252_v7 = vpop.permute.xlu0 %1251 }
 0x1fc   : > { %1152 = vmatmul.bf16.vlgmr.msra.gmra.mxu1 %v2219_v60 }
 0x1fe   : > { %1419 = vmatpush.bf16.msra.mxu2 %v2231_v31 }
 0x202   : > { %1420 = vmatpush.bf16.msra.mxu2 %v2230_v32 }
 0x206   : > { %1421 = vmatpush.bf16.msra.mxu2 %v2229_v34  ;;  %v1257_v34 = vpop.permute.xlu1 %1256 }
 0x20a   : > { %1422 = vmatpush.bf16.msra.mxu2 %v2228_v35 }
 0x20c   : > { %1157 = vmatmul.bf16.gmra.mxu1 %v2220_v25 }
 0x20e   : > { %1423 = vmatpush.bf16.msra.mxu2 %v2227_v36 }
 0x21c   : > { %1162 = vmatmul.bf16.gmra.mxu1 %v2221_v26 }
 0x22c   : > { %1167 = vmatmul.bf16.gmra.mxu1 %v2222_v27 }
 0x23c   : > { %1172 = vmatmul.bf16.gmra.mxu1 %v2223_v28 }
 0x24c   : > { %1177 = vmatmul.bf16.gmra.mxu1 %v2224_v19  ;;  %v735_v19 = vld [vmem:[#allocation2 + $0x40] sm:$0xff] }
 0x24d   : > { %v1316_v32 = vmul.f32 %v3126_v44, %v735_v19 }
 0x25c   : > { %1182 = vmatmul.bf16.gmra.mxu1 %v2225_v33  ;;  %v1317_v33 = vmul.f32 %v3126_v44, %v736_v30 }
 0x26c   : > { %1187 = vmatmul.bf16.gmra.mxu1 %v2226_v37 }
 0x279   : > { %v1153_v40 = vpop.f32.mrf.mxu1 }
 0x27a   : > { %v1289_v52 = vmul.f32 %v1212_v50, %v1153_v40  ;;  %v737_v50 = vld [vmem:[#allocation2 + $0x50] sm:$0xff] }
 0x27c   : > { %v1324_v49 = vadd.f32 %v1308_v53, %v1289_v52  ;;  %v738_v52 = vld [vmem:[#allocation2 + $0x58] sm:$0xff]  ;;  %v1262_v53 = vpop.permute.xlu2 %1261 }
 0x281   : > { %v1155_v58 = vpop.f32.mrf.mxu1 }
 0x282   : > { %v1290_v47 = vmul.f32 %v1217_v57, %v1155_v58  ;;  %v1318_v57 = vmul.f32 %v3126_v44, %v737_v50  ;;  %v1319_v58 = vmul.f32 %v3126_v44, %v738_v52 }
 0x284   : > { %v1325_v59 = vadd.f32 %v1309_v54, %v1290_v47  ;;  %v1267_v47 = vpop.permute.xlu0 %1266 }
 0x286   : > { %v1340_v61 = vpack.c.bf16 %v1325_v59, %v1324_v49 }
 0x288   : > { %1424 = vmatmul.bf16.vlgmr.msra.gmra.mxu2 %v1340_v61 }
 0x289   : > { %v1158_v62 = vpop.f32.mrf.mxu1 }
 0x28a   : > { %v1291_v2 = vmul.f32 %v1222_v1, %v1158_v62 }
 0x28c   : > { %v1326_v46 = vadd.f32 %v1310_v39, %v1291_v2  ;;  %v2241_v2 = vld [vmem:[%s2887_s28 + $0x30] sm:$0xff] }
 0x28d   : > { %v739_v39 = vld [vmem:[#allocation2 + $0x60] sm:$0xff]  ;;  %1558 = vmatpush.bf16.msra.mxu3 %v2241_v2 }
 0x291   : > { %v1160_v4 = vpop.f32.mrf.mxu1 }
 0x292   : > { %v1292_v41 = vmul.f32 %v1227_v51, %v1160_v4  ;;  %v2240_v51 = vld [vmem:[%s2887_s28 + $0x28] sm:$0xff]  ;;  %v1272_v4 = vpop.permute.xlu1 %1271 }
 0x293   : > { %1559 = vmatpush.bf16.msra.mxu3 %v2240_v51 }
 0x294   : > { %v1327_v5 = vadd.f32 %v1311_v3, %v1292_v41  ;;  %v740_v3 = vld [vmem:[#allocation2 + $0x68] sm:$0xff] }
 0x296   : > { %v1341_v42 = vpack.c.bf16 %v1327_v5, %v1326_v46  ;;  %v1320_v46 = vmul.f32 %v3126_v44, %v739_v39  ;;  %v1321_v5 = vmul.f32 %v3126_v44, %v740_v3 }
 0x297   : > { %1560 = vmatpush.bf16.msra.mxu3 %v2239_v9 }
 0x298   : > { %1429 = vmatmul.bf16.gmra.mxu2 %v1341_v42  ;;  %v1277_v42 = vpop.permute.xlu2 %1276 }
 0x299   : > { %v1163_v6 = vpop.f32.mrf.mxu1 }
 0x29a   : > { %v1293_v10 = vmul.f32 %v1232_v38, %v1163_v6  ;;  %v1287_v21 = vpop.permute.xlu1 %1286 }
 0x29c   : > { %v1328_v55 = vadd.f32 %v1312_v11, %v1293_v10 }
 0x2a1   : > { %v1165_v14 = vpop.f32.mrf.mxu1 }
 0x2a2   : > { %v1294_v15 = vmul.f32 %v1237_v13, %v1165_v14  ;;  %v2238_v13 = vld [vmem:[%s2887_s28 + $0x18] sm:$0xff]  ;;  %v741_v14 = vld [vmem:[#allocation2 + $0x70] sm:$0xff] }
 0x2a3   : > { %1561 = vmatpush.bf16.msra.mxu3 %v2238_v13 }
 0x2a4   : > { %v1329_v16 = vadd.f32 %v1313_v12, %v1294_v15  ;;  %v742_v15 = vld [vmem:[#allocation2 + $0x78] sm:$0xff] }
 0x2a5   : > { %v1323_v20 = vmul.f32 %v3126_v44, %v742_v15 }
 0x2a6   : > { %v1342_v17 = vpack.c.bf16 %v1329_v16, %v1328_v55  ;;  %v2237_v55 = vld [vmem:[%s2887_s28 + $0x10] sm:$0xff]  ;;  %v1282_v16 = vpop.permute.xlu0 %1281 }
 0x2a7   : > { %1562 = vmatpush.bf16.msra.mxu3 %v2237_v55 }
 0x2a8   : > { %1434 = vmatmul.bf16.gmra.mxu2 %v1342_v17 }
 0x2a9   : > { %v1168_v18 = vpop.f32.mrf.mxu1 }
 0x2aa   : > { %v1295_v56 = vmul.f32 %v1242_v45, %v1168_v18  ;;  %v1322_v18 = vmul.f32 %v3126_v44, %v741_v14 }
 0x2ac   : > { %v1330_v26 = vadd.f32 %v1314_v22, %v1295_v56  ;;  %v2236_v56 = vld [vmem:[%s2887_s28 + $0x8] sm:$0xff] }
 0x2ad   : > { %1563 = vmatpush.bf16.msra.mxu3 %v2236_v56 }
 0x2b1   : > { %v1170_v60 = vpop.f32.mrf.mxu1 }
 0x2b2   : > { %v1296_v25 = vmul.f32 %v1247_v24, %v1170_v60  ;;  %v2235_v60 = vld [vmem:[%s2887_s28] sm:$0xff]  ;;  %s1699_s28 = scalar_lea.vmem [#allocation11], %s2195_s21 }
 0x2b3   : > { %1564 = vmatpush.bf16.msra.mxu3 %v2235_v60 }
 0x2b4   : > { %v1331_v27 = vadd.f32 %v1315_v23, %v1296_v25 }
 0x2b6   : > { %v1343_v28 = vpack.c.bf16 %v1331_v27, %v1330_v26  ;;  %v2411_v27 = vld [vmem:[%s432_s15] ss:$0 sm:$0xff]  ;;  %s3270_s15 = sld [smem:[#allocation63_spill]] (!%p2196_p5) }
 0x2b8   : > { %1439 = vmatmul.bf16.gmra.mxu2 %v1343_v28 }
 0x2b9   : > { %v1173_v29 = vpop.f32.mrf.mxu1 }
 0x2ba   : > { %v1297_v31 = vmul.f32 %v1252_v7, %v1173_v29 }
 0x2bc   : > { %v1332_v37 = vadd.f32 %v1316_v32, %v1297_v31 }
 0x2c1   : > { %v1175_v35 = vpop.f32.mrf.mxu1 }
 0x2c2   : > { %v1298_v36 = vmul.f32 %v1257_v34, %v1175_v35 }
 0x2c4   : > { %v1333_v40 = vadd.f32 %v1317_v33, %v1298_v36 }
 0x2c6   : > { %v1344_v43 = vpack.c.bf16 %v1333_v40, %v1332_v37 }
 0x2c8   : > { %1444 = vmatmul.bf16.gmra.mxu2 %v1344_v43 }
 0x2c9   : > { %v1178_v48 = vpop.f32.mrf.mxu1 }
 0x2ca   : > { %v1299_v54 = vmul.f32 %v1262_v53, %v1178_v48 }
 0x2cc   : > { %v1334_v61 = vadd.f32 %v1318_v57, %v1299_v54 }
 0x2d1   : > { %v1180_v49 = vpop.f32.mrf.mxu1 }
 0x2d2   : > { %v1300_v59 = vmul.f32 %v1267_v47, %v1180_v49 }
 0x2d4   : > { %v1335_v62 = vadd.f32 %v1319_v58, %v1300_v59 }
 0x2d6   : > { %v1345_v63 = vpack.c.bf16 %v1335_v62, %v1334_v61 }
 0x2d8   : > { %1449 = vmatmul.bf16.gmra.mxu2 %v1345_v63 }
 0x2d9   : > { %v1183_v1 = vpop.f32.mrf.mxu1 }
 0x2da   : > { %v1301_v41 = vmul.f32 %v1272_v4, %v1183_v1 }
 0x2dc   : > { %v1336_v38 = vadd.f32 %v1320_v46, %v1301_v41 }
 0x2e1   : > { %v1185_v6 = vpop.f32.mrf.mxu1 }
 0x2e2   : > { %v1302_v8 = vmul.f32 %v1277_v42, %v1185_v6 }
 0x2e4   : > { %v1337_v10 = vadd.f32 %v1321_v5, %v1302_v8 }
 0x2e6   : > { %v1346_v11 = vpack.c.bf16 %v1337_v10, %v1336_v38 }
 0x2e8   : > { %1454 = vmatmul.bf16.gmra.mxu2 %v1346_v11 }
 0x2e9   : > { %v1188_v12 = vpop.f32.mrf.mxu1 }
 0x2ea   : > { %v1303_v17 = vmul.f32 %v1282_v16, %v1188_v12 }
 0x2ec   : > { %v1338_v23 = vadd.f32 %v1322_v18, %v1303_v17 }
 0x2f1   : > { %v1190_v45 = vpop.f32.mrf.mxu1 }
 0x2f2   : > { %v1304_v22 = vmul.f32 %v1287_v21, %v1190_v45  ;;  %v3159_v45 = vld [vmem:[%s366_s17] ss:$0 sm:$0xff] }
 0x2f4   : > { %v1339_v24 = vadd.f32 %v1323_v20, %v1304_v22 }
 0x2f6   : > { %v1347_v25 = vpack.c.bf16 %v1339_v24, %v1338_v23 }
 0x2f8   : > { %1459 = vmatmul.bf16.gmra.mxu2 %v1347_v25 }
 0x30b   : > { %v1425_v26 = vpop.f32.mrf.mxu2 }
 0x30c   : > { %v1426_v28 = vadd.f32 %v2411_v27, %v1425_v26 }
 0x30e   : > { %v1465_v19 = vmax.f32 %v1426_v28, 0.0 }
 0x313   : > { %v1427_v29 = vpop.f32.mrf.mxu2 }
 0x314   : > { %v1428_v44 = vadd.f32 %v2411_v27, %v1427_v29 }
 0x316   : > { %v1466_v30 = vmax.f32 %v1428_v44, 0.0 }
 0x318   : > { %v1481_v7 = vpack.c.bf16 %v1466_v30, %v1465_v19 }
 0x31a   : > { %1565 = vmatmul.bf16.vlgmr.msra.gmra.mxu3 %v1481_v7 }
 0x31b   : > { %v1430_v31 = vpop.f32.mrf.mxu2 }
 0x31c   : > { %v1431_v32 = vadd.f32 %v2411_v27, %v1430_v31 }
 0x31e   : > { %v1467_v35 = vmax.f32 %v1431_v32, 0.0 }
 0x323   : > { %v1432_v33 = vpop.f32.mrf.mxu2 }
 0x324   : > { %v1433_v34 = vadd.f32 %v2411_v27, %v1432_v33 }
 0x326   : > { %v1468_v36 = vmax.f32 %v1433_v34, 0.0 }
 0x328   : > { %v1482_v37 = vpack.c.bf16 %v1468_v36, %v1467_v35 }
 0x32a   : > { %1570 = vmatmul.bf16.gmra.mxu3 %v1482_v37 }
 0x32b   : > { %v1435_v40 = vpop.f32.mrf.mxu2 }
 0x32c   : > { %v1436_v43 = vadd.f32 %v2411_v27, %v1435_v40 }
 0x32e   : > { %v1469_v52 = vmax.f32 %v1436_v43, 0.0 }
 0x333   : > { %v1437_v48 = vpop.f32.mrf.mxu2 }
 0x334   : > { %v1438_v50 = vadd.f32 %v2411_v27, %v1437_v48 }
 0x336   : > { %v1470_v53 = vmax.f32 %v1438_v50, 0.0 }
 0x338   : > { %v1483_v54 = vpack.c.bf16 %v1470_v53, %v1469_v52 }
 0x33a   : > { %1575 = vmatmul.bf16.gmra.mxu3 %v1483_v54 }
 0x33b   : > { %v1440_v57 = vpop.f32.mrf.mxu2 }
 0x33c   : > { %v1441_v58 = vadd.f32 %v2411_v27, %v1440_v57 }
 0x33e   : > { %v1471_v59 = vmax.f32 %v1441_v58, 0.0 }
 0x343   : > { %v1442_v47 = vpop.f32.mrf.mxu2 }
 0x344   : > { %v1443_v49 = vadd.f32 %v2411_v27, %v1442_v47 }
 0x346   : > { %v1472_v61 = vmax.f32 %v1443_v49, 0.0 }
 0x348   : > { %v1484_v62 = vpack.c.bf16 %v1472_v61, %v1471_v59 }
 0x34a   : > { %1580 = vmatmul.bf16.gmra.mxu3 %v1484_v62 }
 0x34b   : > { %v1445_v63 = vpop.f32.mrf.mxu2 }
 0x34c   : > { %v1446_v0 = vadd.f32 %v2411_v27, %v1445_v63 }
 0x34e   : > { %v1473_v39 = vmax.f32 %v1446_v0, 0.0 }
 0x353   : > { %v1447_v1 = vpop.f32.mrf.mxu2 }
 0x354   : > { %v1448_v2 = vadd.f32 %v2411_v27, %v1447_v1 }
 0x356   : > { %v1474_v3 = vmax.f32 %v1448_v2, 0.0 }
 0x358   : > { %v1485_v51 = vpack.c.bf16 %v1474_v3, %v1473_v39 }
 0x35a   : > { %1585 = vmatmul.bf16.gmra.mxu3 %v1485_v51 }
 0x35b   : > { %v1450_v4 = vpop.f32.mrf.mxu2 }
 0x35c   : > { %v1451_v41 = vadd.f32 %v2411_v27, %v1450_v4 }
 0x35e   : > { %v1475_v42 = vmax.f32 %v1451_v41, 0.0 }
 0x363   : > { %v1452_v46 = vpop.f32.mrf.mxu2 }
 0x364   : > { %v1453_v5 = vadd.f32 %v2411_v27, %v1452_v46 }
 0x366   : > { %v1476_v6 = vmax.f32 %v1453_v5, 0.0 }
 0x368   : > { %v1486_v8 = vpack.c.bf16 %v1476_v6, %v1475_v42 }
 0x36a   : > { %1590 = vmatmul.bf16.gmra.mxu3 %v1486_v8 }
 0x36b   : > { %v1455_v9 = vpop.f32.mrf.mxu2 }
 0x36c   : > { %v1456_v38 = vadd.f32 %v2411_v27, %v1455_v9 }
 0x36e   : > { %v1477_v12 = vmax.f32 %v1456_v38, 0.0 }
 0x373   : > { %v1457_v10 = vpop.f32.mrf.mxu2 }
 0x374   : > { %v1458_v11 = vadd.f32 %v2411_v27, %v1457_v10 }
 0x376   : > { %v1478_v13 = vmax.f32 %v1458_v11, 0.0 }
 0x378   : > { %v1487_v14 = vpack.c.bf16 %v1478_v13, %v1477_v12 }
 0x37a   : > { %1595 = vmatmul.bf16.gmra.mxu3 %v1487_v14 }
 0x37b   : > { %v1460_v15 = vpop.f32.mrf.mxu2 }
 0x37c   : > { %v1461_v55 = vadd.f32 %v2411_v27, %v1460_v15  ;;  %v1670_v15 = vld [vmem:[#allocation8] sm:$0xff] }
 0x37e   : > { %v1479_v18 = vmax.f32 %v1461_v55, 0.0  ;;  %v1695_v55 = vpop.permute.xlu2 %1694 }
 0x383   : > { %v1462_v16 = vpop.f32.mrf.mxu2 }
 0x384   : > { %v1463_v17 = vadd.f32 %v2411_v27, %v1462_v16 }
 0x386   : > { %v1480_v20 = vmax.f32 %v1463_v17, 0.0 }
 0x388   : > { %v1488_v21 = vpack.c.bf16 %v1480_v20, %v1479_v18 }
 0x38a   : > { %1600 = vmatmul.bf16.gmra.mxu3 %v1488_v21 }
 0x39d   : > { %v1566_v56 = vpop.f32.mrf.mxu3 }
 0x39e   : > { %v1567_v22 = vadd.f32 %v3159_v45, %v1566_v56 }
 0x3a0   : > { %v3162_v23 = vmax.f32 %v1567_v22, 0.0 }
 0x3a2   : > { %1622 = vst [vmem:[#allocation2] sm:$0xff] %v3162_v23 }
 0x3a5   : > { %v1568_v24 = vpop.f32.mrf.mxu3 }
 0x3a6   : > { %v1569_v60 = vadd.f32 %v3159_v45, %v1568_v24 }
 0x3a8   : > { %v3166_v25 = vmax.f32 %v1569_v60, 0.0 }
 0x3aa   : > { %1623 = vst [vmem:[#allocation2 + $0x8] sm:$0xff] %v3166_v25  ;;  %v2286_v26 = vpack.c.bf16 %v3166_v25, %v3162_v23 }
 0x3ac   : > { %2287 = vst [vmem:[#allocation3 + $0x30] sm:$0xff] %v2286_v26  }
 0x3ad   : > { %v1571_v27 = vpop.f32.mrf.mxu3 }
 0x3ae   : > { %v1572_v28 = vadd.f32 %v3159_v45, %v1571_v27 }
 0x3b0   : > { %v3172_v29 = vmax.f32 %v1572_v28, 0.0 }
 0x3b2   : > { %1624 = vst [vmem:[#allocation2 + $0x10] sm:$0xff] %v3172_v29 }
 0x3b5   : > { %v1573_v44 = vpop.f32.mrf.mxu3 }
 0x3b6   : > { %v1574_v19 = vadd.f32 %v3159_v45, %v1573_v44 }
 0x3b8   : > { %v3176_v30 = vmax.f32 %v1574_v19, 0.0 }
 0x3ba   : > { %1625 = vst [vmem:[#allocation2 + $0x18] sm:$0xff] %v3176_v30  ;;  %v2291_v7 = vpack.c.bf16 %v3176_v30, %v3172_v29 }
 0x3bc   : > { %2330 = vst [vmem:[#allocation3] sm:$0xff] %v2291_v7  }
 0x3bd   : > { %v1576_v31 = vpop.f32.mrf.mxu3 }
 0x3be   : > { %v1577_v32 = vadd.f32 %v3159_v45, %v1576_v31 }
 0x3c0   : > { %v3182_v33 = vmax.f32 %v1577_v32, 0.0 }
 0x3c2   : > { %1626 = vst [vmem:[#allocation2 + $0x20] sm:$0xff] %v3182_v33 }
 0x3c5   : > { %v1578_v34 = vpop.f32.mrf.mxu3 }
 0x3c6   : > { %v1579_v35 = vadd.f32 %v3159_v45, %v1578_v34 }
 0x3c8   : > { %v3186_v36 = vmax.f32 %v1579_v35, 0.0 }
 0x3ca   : > { %1627 = vst [vmem:[#allocation2 + $0x28] sm:$0xff] %v3186_v36  ;;  %v2296_v37 = vpack.c.bf16 %v3186_v36, %v3182_v33 }
 0x3cc   : > { %2331 = vst [vmem:[#allocation3 + $0x18] sm:$0xff] %v2296_v37  }
 0x3cd   : > { %v1581_v40 = vpop.f32.mrf.mxu3 }
 0x3ce   : > { %v1582_v43 = vadd.f32 %v3159_v45, %v1581_v40 }
 0x3d0   : > { %v1612_v48 = vmax.f32 %v1582_v43, 0.0 }
 0x3d2   : > { %1628 = vst [vmem:[#allocation2 + $0x30] sm:$0xff] %v1612_v48 }
 0x3d5   : > { %v1583_v50 = vpop.f32.mrf.mxu3 }
 0x3d6   : > { %v1584_v52 = vadd.f32 %v3159_v45, %v1583_v50 }
 0x3d8   : > { %v1613_v53 = vmax.f32 %v1584_v52, 0.0 }
 0x3da   : > { %1629 = vst [vmem:[#allocation2 + $0x38] sm:$0xff] %v1613_v53  ;;  %v2301_v54 = vpack.c.bf16 %v1613_v53, %v1612_v48 }
 0x3dc   : > { %2332 = vst [vmem:[#allocation3 + $0x10] sm:$0xff] %v2301_v54  }
 0x3dd   : > { %v1586_v57 = vpop.f32.mrf.mxu3 }
 0x3de   : > { %v1587_v58 = vadd.f32 %v3159_v45, %v1586_v57 }
 0x3e0   : > { %v1614_v47 = vmax.f32 %v1587_v58, 0.0 }
 0x3e2   : > { %1630 = vst [vmem:[#allocation2 + $0x40] sm:$0xff] %v1614_v47 }
 0x3e5   : > { %v1588_v49 = vpop.f32.mrf.mxu3 }
 0x3e6   : > { %v1589_v59 = vadd.f32 %v3159_v45, %v1588_v49 }
 0x3e8   : > { %v1615_v61 = vmax.f32 %v1589_v59, 0.0 }
 0x3ea   : > { %1631 = vst [vmem:[#allocation2 + $0x48] sm:$0xff] %v1615_v61  ;;  %v2306_v62 = vpack.c.bf16 %v1615_v61, %v1614_v47 }
 0x3ec   : > { %2333 = vst [vmem:[#allocation3 + $0x8] sm:$0xff] %v2306_v62  }
 0x3ed   : > { %v1591_v63 = vpop.f32.mrf.mxu3 }
 0x3ee   : > { %v1592_v0 = vadd.f32 %v3159_v45, %v1591_v63 }
 0x3f0   : > { %v1616_v1 = vmax.f32 %v1592_v0, 0.0 }
 0x3f2   : > { %1632 = vst [vmem:[#allocation2 + $0x50] sm:$0xff] %v1616_v1 }
 0x3f5   : > { %v1593_v2 = vpop.f32.mrf.mxu3 }
 0x3f6   : > { %v1594_v39 = vadd.f32 %v3159_v45, %v1593_v2 }
 0x3f8   : > { %v1617_v3 = vmax.f32 %v1594_v39, 0.0 }
 0x3fa   : > { %1633 = vst [vmem:[#allocation2 + $0x58] sm:$0xff] %v1617_v3  ;;  %v2311_v51 = vpack.c.bf16 %v1617_v3, %v1616_v1 }
 0x3fc   : > { %2334 = vst [vmem:[#allocation3 + $0x20] sm:$0xff] %v2311_v51  }
 0x3fd   : > { %v1596_v4 = vpop.f32.mrf.mxu3 }
 0x3fe   : > { %v1597_v41 = vadd.f32 %v3159_v45, %v1596_v4 }
 0x400   : > { %v1618_v46 = vmax.f32 %v1597_v41, 0.0 }
 0x402   : > { %1634 = vst [vmem:[#allocation2 + $0x60] sm:$0xff] %v1618_v46 }
 0x405   : > { %v1598_v5 = vpop.f32.mrf.mxu3 }
 0x406   : > { %v1599_v42 = vadd.f32 %v3159_v45, %v1598_v5 }
 0x408   : > { %v1619_v6 = vmax.f32 %v1599_v42, 0.0 }
 0x40a   : > { %1635 = vst [vmem:[#allocation2 + $0x68] sm:$0xff] %v1619_v6  ;;  %v2316_v8 = vpack.c.bf16 %v1619_v6, %v1618_v46 }
 0x40c   : > { %2335 = vst [vmem:[#allocation3 + $0x28] sm:$0xff] %v2316_v8  }
 0x40d   : > { %v1601_v9 = vpop.f32.mrf.mxu3 }
 0x40e   : > { %v1602_v38 = vadd.f32 %v3159_v45, %v1601_v9 }
 0x410   : > { %v1620_v10 = vmax.f32 %v1602_v38, 0.0 }
 0x412   : > { %1636 = vst [vmem:[#allocation2 + $0x70] sm:$0xff] %v1620_v10 }
 0x415   : > { %v1603_v11 = vpop.f32.mrf.mxu3 }
 0x416   : > { %v1604_v12 = vadd.f32 %v3159_v45, %v1603_v11 }
 0x418   : > { %v1621_v13 = vmax.f32 %v1604_v12, 0.0 }
 0x41a   : > { %1637 = vst [vmem:[#allocation2 + $0x78] sm:$0xff] %v1621_v13  ;;  %v2321_v14 = vpack.c.bf16 %v1621_v13, %v1620_v10  ;;  %1671 = vmatpush.msrb.mxu0 %v1621_v13 }
 0x41c   : > { %2336 = vst [vmem:[#allocation3 + $0x38] sm:$0xff] %v2321_v14   ;;  %1672 = vmatpush.msrb.mxu0 %v1620_v10 }
 0x41e   : > { %1673 = vmatpush.msrb.mxu0 %v1619_v6 }
 0x420   : > { %1674 = vmatpush.msrb.mxu0 %v1618_v46 }
 0x422   : > { %1675 = vmatpush.msrb.mxu0 %v1617_v3 }
 0x424   : > { %1676 = vmatpush.msrb.mxu0 %v1616_v1 }
 0x426   : > { %1677 = vmatpush.msrb.mxu0 %v1615_v61 }
 0x428   : > { %1678 = vmatpush.msrb.mxu0 %v1614_v47 }
 0x42a   : > { %1679 = vmatpush.msrb.mxu0 %v1613_v53 }
 0x42c   : > { %1680 = vmatpush.msrb.mxu0 %v1612_v48 }
 0x42e   : > { %1681 = vmatpush.msrb.mxu0 %v3186_v36 }
 0x430   : > { %1682 = vmatpush.msrb.mxu0 %v3182_v33 }
 0x432   : > { %1683 = vmatpush.msrb.mxu0 %v3176_v30 }
 0x434   : > { %1684 = vmatpush.msrb.mxu0 %v3172_v29 }
 0x436   : > { %1685 = vmatpush.msrb.mxu0 %v3166_v25 }
 0x438   : > { %1686 = vmatpush.msrb.mxu0 %v3162_v23 }
 0x439   : > { %1687 = vmatmul.f32.vlgmr.msrb.gmra.mxu0 %v1670_v15 }
 0x4b5   : > { %1704 = sbr.rel (%p2196_p5) target bundleno = 1635 (0x663), region = 202 }
 0x4b6   : > { %v1688_v16 = vpop.f32.mrf.mxu0 }
 0x4b7   : > { %v1697_v17 = vmul.f32 %v1695_v55, %v1688_v16 }
 0x4b9   : > { %1700 = vst [vmem:[%s1699_s28] sm:$0xff] %v1697_v17 }
 0x4ba   : > { %v1759_v18 = vld [vmem:[#allocation10 + $0x178] sm:$0xff]  ;;  %v1758_v21 = vld [vmem:[#allocation10 + $0x170] sm:$0xff]  ;;  %v1757_v23 = vld [vmem:[#allocation10 + $0x168] sm:$0xff] }
 0x4bb   : > { %v1727_v20 = vld [vmem:[#allocation10 + $0x78] sm:$0xff]  ;;  %1820 = vmatpush.msra.mxu2 %v1759_v18  ;;  %v1726_v56 = vld [vmem:[#allocation10 + $0x70] sm:$0xff]  ;;  %v1725_v60 = vld [vmem:[#allocation10 + $0x68] sm:$0xff] }
 0x4bc   : > { %1780 = vmatpush.msra.mxu0 %v1727_v20  ;;  %v1775_v45 = vld [vmem:[#allocation10 + $0x1f8] sm:$0xff]  ;;  %v1774_v24 = vld [vmem:[#allocation10 + $0x1f0] sm:$0xff]  ;;  %v1773_v26 = vld [vmem:[#allocation10 + $0x1e8] sm:$0xff] }
 0x4bd   : > { %v1743_v22 = vld [vmem:[#allocation10 + $0xf8] sm:$0xff]  ;;  %1840 = vmatpush.msra.mxu3 %v1775_v45  ;;  %1821 = vmatpush.msra.mxu2 %v1758_v21  ;;  %v1742_v25 = vld [vmem:[#allocation10 + $0xf0] sm:$0xff]  ;;  %v1756_v27 = vld [vmem:[#allocation10 + $0x160] sm:$0xff] }
 0x4be   : > { %1800 = vmatpush.msra.mxu1 %v1743_v22  ;;  %1781 = vmatpush.msra.mxu0 %v1726_v56  ;;  %v1724_v28 = vld [vmem:[#allocation10 + $0x60] sm:$0xff]  ;;  %v1741_v29 = vld [vmem:[#allocation10 + $0xe8] sm:$0xff]  ;;  %v1755_v30 = vld [vmem:[#allocation10 + $0x158] sm:$0xff]  ;;  %v1860_v22 = vlaneseq }
 0x4bf   : > { %1841 = vmatpush.msra.mxu3 %v1774_v24  ;;  %1822 = vmatpush.msra.mxu2 %v1757_v23  ;;  %v1772_v44 = vld [vmem:[#allocation10 + $0x1e0] sm:$0xff]  ;;  %v1723_v7 = vld [vmem:[#allocation10 + $0x58] sm:$0xff]  ;;  %v1754_v33 = vld [vmem:[#allocation10 + $0x150] sm:$0xff] }
 0x4c0   : > { %1801 = vmatpush.msra.mxu1 %v1742_v25  ;;  %1782 = vmatpush.msra.mxu0 %v1725_v60  ;;  %v1740_v19 = vld [vmem:[#allocation10 + $0xe0] sm:$0xff]  ;;  %v1771_v31 = vld [vmem:[#allocation10 + $0x1d8] sm:$0xff]  ;;  %v1722_v34 = vld [vmem:[#allocation10 + $0x50] sm:$0xff] }
 0x4c1   : > { %1842 = vmatpush.msra.mxu3 %v1773_v26  ;;  %1823 = vmatpush.msra.mxu2 %v1756_v27  ;;  %v1739_v32 = vld [vmem:[#allocation10 + $0xd8] sm:$0xff]  ;;  %v1770_v35 = vld [vmem:[#allocation10 + $0x1d0] sm:$0xff]  ;;  %v1753_v37 = vld [vmem:[#allocation10 + $0x148] sm:$0xff]  ;;  %v1861_v26 = vand.u32 127, %v1860_v22 }
 0x4c2   : > { %1802 = vmatpush.msra.mxu1 %v1741_v29  ;;  %1783 = vmatpush.msra.mxu0 %v1724_v28  ;;  %v1738_v36 = vld [vmem:[#allocation10 + $0xd0] sm:$0xff]  ;;  %v1721_v40 = vld [vmem:[#allocation10 + $0x48] sm:$0xff]  ;;  %v1752_v50 = vld [vmem:[#allocation10 + $0x140] sm:$0xff] }
 0x4c3   : > { %1843 = vmatpush.msra.mxu3 %v1772_v44  ;;  %1824 = vmatpush.msra.mxu2 %v1755_v30  ;;  %v1769_v43 = vld [vmem:[#allocation10 + $0x1c8] sm:$0xff]  ;;  %v1720_v52 = vld [vmem:[#allocation10 + $0x40] sm:$0xff]  ;;  %v1751_v57 = vld [vmem:[#allocation10 + $0x138] sm:$0xff]  ;;  %vm1862_vm0 = vcmp.lt.s32.totalorder %v1861_v26, 4 }
 0x4c4   : > { %1803 = vmatpush.msra.mxu1 %v1740_v19  ;;  %1784 = vmatpush.msra.mxu0 %v1723_v7  ;;  %v1737_v48 = vld [vmem:[#allocation10 + $0xc8] sm:$0xff]  ;;  %v1768_v53 = vld [vmem:[#allocation10 + $0x1c0] sm:$0xff]  ;;  %v1719_v58 = vld [vmem:[#allocation10 + $0x38] sm:$0xff] }
 0x4c5   : > { %1844 = vmatpush.msra.mxu3 %v1771_v31  ;;  %1825 = vmatpush.msra.mxu2 %v1754_v33  ;;  %v1736_v54 = vld [vmem:[#allocation10 + $0xc0] sm:$0xff]  ;;  %v1767_v47 = vld [vmem:[#allocation10 + $0x1b8] sm:$0xff]  ;;  %v1750_v59 = vld [vmem:[#allocation10 + $0x130] sm:$0xff] }
 0x4c6   : > { %1804 = vmatpush.msra.mxu1 %v1739_v32  ;;  %1785 = vmatpush.msra.mxu0 %v1722_v34  ;;  %v1735_v49 = vld [vmem:[#allocation10 + $0xb8] sm:$0xff]  ;;  %v1718_v61 = vld [vmem:[#allocation10 + $0x30] sm:$0xff]  ;;  %v1749_v0 = vld [vmem:[#allocation10 + $0x128] sm:$0xff] }
 0x4c7   : > { %1845 = vmatpush.msra.mxu3 %v1770_v35  ;;  %1826 = vmatpush.msra.mxu2 %v1753_v37  ;;  %v1766_v62 = vld [vmem:[#allocation10 + $0x1b0] sm:$0xff]  ;;  %v1717_v1 = vld [vmem:[#allocation10 + $0x28] sm:$0xff]  ;;  %v1748_v3 = vld [vmem:[#allocation10 + $0x120] sm:$0xff] }
 0x4c8   : > { %1805 = vmatpush.msra.mxu1 %v1738_v36  ;;  %1786 = vmatpush.msra.mxu0 %v1721_v40  ;;  %v1734_v63 = vld [vmem:[#allocation10 + $0xb0] sm:$0xff]  ;;  %v1765_v2 = vld [vmem:[#allocation10 + $0x1a8] sm:$0xff]  ;;  %v1716_v51 = vld [vmem:[#allocation10 + $0x20] sm:$0xff] }
 0x4c9   : > { %1846 = vmatpush.msra.mxu3 %v1769_v43  ;;  %1827 = vmatpush.msra.mxu2 %v1752_v50  ;;  %v1733_v39 = vld [vmem:[#allocation10 + $0xa8] sm:$0xff]  ;;  %v1764_v4 = vld [vmem:[#allocation10 + $0x1a0] sm:$0xff]  ;;  %v1747_v46 = vld [vmem:[#allocation10 + $0x118] sm:$0xff] }
 0x4ca   : > { %1806 = vmatpush.msra.mxu1 %v1737_v48  ;;  %1787 = vmatpush.msra.mxu0 %v1720_v52  ;;  %v1732_v41 = vld [vmem:[#allocation10 + $0xa0] sm:$0xff]  ;;  %v1715_v5 = vld [vmem:[#allocation10 + $0x18] sm:$0xff]  ;;  %v1746_v8 = vld [vmem:[#allocation10 + $0x110] sm:$0xff] }
 0x4cb   : > { %1847 = vmatpush.msra.mxu3 %v1768_v53  ;;  %1828 = vmatpush.msra.mxu2 %v1751_v57  ;;  %v1763_v42 = vld [vmem:[#allocation10 + $0x198] sm:$0xff]  ;;  %v1714_v9 = vld [vmem:[#allocation10 + $0x10] sm:$0xff]  ;;  %v1745_v11 = vld [vmem:[#allocation10 + $0x108] sm:$0xff] }
 0x4cc   : > { %1807 = vmatpush.msra.mxu1 %v1736_v54  ;;  %1788 = vmatpush.msra.mxu0 %v1719_v58  ;;  %v1731_v6 = vld [vmem:[#allocation10 + $0x98] sm:$0xff]  ;;  %v1762_v38 = vld [vmem:[#allocation10 + $0x190] sm:$0xff]  ;;  %v1713_v12 = vld [vmem:[#allocation10 + $0x8] sm:$0xff] }
 0x4cd   : > { %1848 = vmatpush.msra.mxu3 %v1767_v47  ;;  %1829 = vmatpush.msra.mxu2 %v1750_v59  ;;  %v1730_v10 = vld [vmem:[#allocation10 + $0x90] sm:$0xff]  ;;  %v1761_v13 = vld [vmem:[#allocation10 + $0x188] sm:$0xff]  ;;  %v1744_v15 = vld [vmem:[#allocation10 + $0x100] sm:$0xff] }
 0x4ce   : > { %1808 = vmatpush.msra.mxu1 %v1735_v49  ;;  %1789 = vmatpush.msra.mxu0 %v1718_v61  ;;  %v1729_v14 = vld [vmem:[#allocation10 + $0x88] sm:$0xff]  ;;  %v1712_v55 = vld [vmem:[#allocation10] sm:$0xff]  ;;  %v1709_v16 = vld [vmem:[#allocation11 + $0x10] sm:$0xff] }
 0x4cf   : > { %1849 = vmatpush.msra.mxu3 %v1766_v62  ;;  %1830 = vmatpush.msra.mxu2 %v1749_v0  ;;  %v1760_v17 = vld [vmem:[#allocation10 + $0x180] sm:$0xff]  ;;  %v1711_v20 = vld [vmem:[#allocation11 + $0x18] sm:$0xff]  ;;  %v1707_v45 = vld [vmem:[#allocation11 + $0x8] sm:$0xff] }
 0x4d0   : > { %1809 = vmatpush.msra.mxu1 %v1734_v63  ;;  %1790 = vmatpush.msra.mxu0 %v1717_v1  ;;  %v1705_v18 = vld [vmem:[#allocation11] sm:$0xff]  ;;  %v2413_v56 = vld [vmem:[%s3270_s15] ss:$0 sm:$0xff] }
 0x4d1   : > { %1850 = vmatpush.msra.mxu3 %v1765_v2  ;;  %1831 = vmatpush.msra.mxu2 %v1748_v3  ;;  %v1728_v21 = vld [vmem:[#allocation10 + $0x80] sm:$0xff] }
 0x4d2   : > { %1810 = vmatpush.msra.mxu1 %v1733_v39  ;;  %1791 = vmatpush.msra.mxu0 %v1716_v51 }
 0x4d3   : > { %1851 = vmatpush.msra.mxu3 %v1764_v4  ;;  %1832 = vmatpush.msra.mxu2 %v1747_v46 }
 0x4d4   : > { %1811 = vmatpush.msra.mxu1 %v1732_v41  ;;  %1792 = vmatpush.msra.mxu0 %v1715_v5 }
 0x4d5   : > { %1852 = vmatpush.msra.mxu3 %v1763_v42  ;;  %1833 = vmatpush.msra.mxu2 %v1746_v8 }
 0x4d6   : > { %1812 = vmatpush.msra.mxu1 %v1731_v6  ;;  %1793 = vmatpush.msra.mxu0 %v1714_v9 }
 0x4d7   : > { %1853 = vmatpush.msra.mxu3 %v1762_v38  ;;  %1834 = vmatpush.msra.mxu2 %v1745_v11 }
 0x4d8   : > { %1813 = vmatpush.msra.mxu1 %v1730_v10  ;;  %1794 = vmatpush.msra.mxu0 %v1713_v12 }
 0x4d9   : > { %1854 = vmatpush.msra.mxu3 %v1761_v13  ;;  %1835 = vmatpush.msra.mxu2 %v1744_v15 }
 0x4da   : > { %1814 = vmatpush.msra.mxu1 %v1729_v14  ;;  %1795 = vmatpush.msra.mxu0 %v1712_v55 }
 0x4db   : > { %1836 = vmatmul.f32.vlgmr.msra.gmra.mxu2 %v1709_v16  ;;  %1855 = vmatpush.msra.mxu3 %v1760_v17 }
 0x4dc   : > { %1796 = vmatmul.f32.vlgmr.msra.gmra.mxu0 %v1705_v18  ;;  %1856 = vmatmul.f32.vlgmr.msra.gmra.mxu3 %v1711_v20 }
 0x4dd   : > { %1815 = vmatpush.msra.mxu1 %v1728_v21 }
 0x4de   : > { %1816 = vmatmul.f32.vlgmr.msra.gmra.mxu1 %v1707_v45 }
 0x559   : > { %v1797_v23 = vpop.f32.mrf.mxu0 }
 0x55a   : > { %v1798_v24 = vadd.f32 %v2413_v56, %v1797_v23 }
 0x55b   : > { %v1817_v60 = vpop.f32.mrf.mxu1 }
 0x55c   : > { %v1818_v25 = vadd.f32 %v1817_v60, %v1798_v24 }
 0x55e   : > { %v1837_v27 = vpop.f32.mrf.mxu2 }
 0x55f   : > { %v1838_v28 = vadd.f32 %v1837_v27, %v1818_v25  ;;  %v1857_v29 = vpop.f32.mrf.mxu3 }
 0x561   : > { %v1858_v44 = vadd.f32 %v1857_v29, %v1838_v28 }
 0x563   : > { %v1863_v19 = vsel %vm1862_vm0, %v1858_v44, -1e+30 }
 0x564   : > { %1864 = vmax.xlane.f32.xlu0 %v1863_v19 }
 0x5d7   : > { %v1865_v30 = vpop.xlane.xlu0 %1864 }
 0x5d8   : > { %v1866_v7 = vsub.f32 %v1863_v19, %v1865_v30 }
 0x5da   : > { %v1867_v31 = vmul.f32 1.442695, %v1866_v7 }
 0x5dc   : > { %2414 = vpow2.f32 %v1867_v31 }
 0x5e2   : > { %v2415_v32 = vpop.eup %2414 }
 0x5e3   : > { %1869 = vadd.xlane.f32.xlu0 %v2415_v32 }
 0x656   : > { %v1870_v33 = vpop.xlane.xlu0 %1869 }
 0x657   : > { %2416 = vlog2.f32 %v1870_v33 }
 0x65d   : > { %v2417_v34 = vpop.eup %2416 }
 0x65e   : > { %v1872_v35 = vmul.f32 0.6931472, %v2417_v34 }
 0x660   : > { %v1873_v36 = vsub.f32 %v1866_v7, %v1872_v35 }
 0x662   : > { %1874 = vst [vmem:[#allocation19] sm:$0xff] %v1873_v36 }
 0x663 PF: > { %p2363_p8 = scmp.eq.s32.totalorder %s2794_s25, 3  ;;  %s2689_s23 = smov [#allocation19]  }
 0x664   : > { %s1881_s5 = sshll.u32 %s2689_s23, 4  ;;  %s3271_s18 = sld [smem:[#allocation64_spill]]  ;;  %s1882_s5 = int_to_ptr.vmem [resolvable:$true] %s1881_s5 }
 0x66a   : > { %s1883_s29 = sshll.u32 %s3271_s18, 4  ;;  %s1884_s29 = int_to_ptr.hbm [resolvable:$true] %s1883_s29 }
 0x66b   : > { %2346 = dma.vmem_to_hbm [thread:$0]  (%p2363_p8), %s1882_s5, 128, %s1884_s29, [#allocation14]  }
 0x66c   : > { %2662 = dma.done.wait (%p2363_p8), [#allocation14], 128  }
 0x66d   : > { %2664 = vsyncadd (%p2363_p8), [#allocation14], 4294967168 }
 0x66e PF: > { %s3272_s24 = sld [smem:[#allocation55_spill]]  ;;  %s3275_s21 = smov %s2671_s22 }
 0x66f   : > { %s3273_s14 = sld [smem:[#allocation54_spill]] }
 0x670   : > { %s3274_s23 = sld [smem:[#allocation56_spill]] }
 0x674   : > { %p31_p9 = scmp.ge.s32.totalorder %s3272_s24, 6  }
 0x675   : > { %s3276_s22 = smov %s3273_s14 }
 0x676   :  { %33 = sbr.rel (!%p31_p9) target bundleno = 16 (0x10), region = 277 }
 0x67b   :  { %1897 = vsyncpa [#allocation13], 1 }
 0x67c   :  { %1899 = vsyncpa [#allocation13 + $0x1], 1 }
 0x67d   :  { %1900 = vsyncpa [#allocation17], 1 }
 0x67e   :  { %1902 = vsyncpa [#allocation17 + $0x1], 1 }
 0x67f   :  { %1903 = vsyncpa [#allocation14], 1 }
 0x680   :  { %1905 = vsyncpa [#allocation14 + $0x1], 1 }
 0x681   :  { %1906 = vsyncpa [#allocation15], 1 }
 0x682   :  { %1908 = vsyncpa [#allocation15 + $0x1], 1 }

</bundles_post_ra>
